<compile_context>
chip_gen: v6e
topology: v6e:2x2x1
jax: 0.10.0
libtpu: 0.0.40
codegen_flags: <defaults>
</compile_context>

<pallas_src>
import jax
import jax.numpy as jnp
from jax.experimental import pallas as pl
from jax.experimental.pallas import tpu as pltpu


def _round_up(x, m):
    return (x + m - 1) // m * m


# ----------------------------- Pallas kernel -------------------------------

def _make_decoder_kernel(n_layers, T, Bp, H, d_model, layer_offsets):
    """Fused multi-layer LSTM kernel, grid-less, everything VMEM-resident.

    Inputs : x      (T*Bp, d_model)   time-major, batch padded to Bp
             state  (2L, Bp, H)       rows 0..L-1 = h0, L..2L-1 = c0
             w_slab (rows, 4H)        per layer: [W_ih^T; W_hh^T; bias; pad]
    Output : out    (T+2L, Bp, H)     rows 0..T-1 = y_t, then h_T, then c_T
    Gate column order is [i, f, o, g] (reordered in the wrapper).
    """
    G = 4 * H

    def cell(gates, c_prev):
        sig = jax.nn.sigmoid(gates[:, :3 * H])        # one wide sigmoid
        i_g = sig[:, 0 * H:1 * H]
        f_g = sig[:, 1 * H:2 * H]
        o_g = sig[:, 2 * H:3 * H]
        g_g = jnp.tanh(gates[:, 3 * H:])
        c_new = f_g * c_prev + i_g * g_g
        h_new = o_g * jnp.tanh(c_new)
        return h_new, c_new

    def kernel(x_ref, state_ref, w_ref, out_ref):
        # ---- unpack the packed weight slab (static, sublane-aligned) ----
        wih, whh, b_rows, bias_b = [], [], [], []
        for l in range(n_layers):
            din = d_model if l == 0 else H
            off = layer_offsets[l]
            wih.append(w_ref[off:off + din, :])                      # (din, 4H)
            whh.append(w_ref[off + din:off + din + H, :])            # (H, 4H)
            b_row = w_ref[off + din + H:off + din + H + 1, :]        # (1, 4H)
            b_rows.append(b_row)
            bias_b.append(jnp.broadcast_to(b_row, (Bp, G)))          # hoisted

        # ---- layer-0 input projection hoisted over all T (one matmul) ----
        gx0 = jnp.dot(x_ref[...], wih[0],
                      preferred_element_type=jnp.float32) + b_rows[0]  # (T*Bp, 4H)

        # ---- initial states (whole aligned (Bp, H) tiles) ----------------
        h = [state_ref[l] for l in range(n_layers)]
        c = [state_ref[n_layers + l] for l in range(n_layers)]

        # ---- wavefront: layer l step t immediately after layer l-1 step t.
        # Fully unrolled; the only cross-statement deps are the true LSTM
        # recurrences, so the scheduler overlaps layer-1 work under layer-0.
        for t in range(T):
            gates = gx0[t * Bp:(t + 1) * Bp, :] + jnp.dot(
                h[0], whh[0], preferred_element_type=jnp.float32)
            h[0], c[0] = cell(gates, c[0])
            for l in range(1, n_layers):
                gates = (jnp.dot(h[l - 1], wih[l],
                                 preferred_element_type=jnp.float32)
                         + jnp.dot(h[l], whh[l],
                                   preferred_element_type=jnp.float32)
                         + bias_b[l])
                h[l], c[l] = cell(gates, c[l])
            out_ref[t] = h[n_layers - 1]          # direct per-step store

        # ---- final states into the same output slab ----------------------
        for l in range(n_layers):
            out_ref[T + l] = h[l]
            out_ref[T + n_layers + l] = c[l]

    return kernel


def decoder_lstm_pallas(x_flat, state0, w_slab, *, n_layers, T, Bp, H,
                        d_model, layer_offsets):
    return pl.pallas_call(
        _make_decoder_kernel(n_layers, T, Bp, H, d_model, layer_offsets),
        out_shape=jax.ShapeDtypeStruct((T + 2 * n_layers, Bp, H), jnp.float32),
        in_specs=[pl.BlockSpec(memory_space=pltpu.MemorySpace.VMEM)] * 3,
        out_specs=pl.BlockSpec(memory_space=pltpu.MemorySpace.VMEM),
    )(x_flat, state0, w_slab)


# ------------------------------ Decoder glue --------------------------------

def init_decoder_params(key, tgt_vocab_size, d_model, d_ff, n_layers):
    keys = jax.random.split(key, 1 + 4 * n_layers)
    emb = 0.1 * jax.random.normal(keys[0], (tgt_vocab_size, d_model), jnp.float32)
    emb = emb.at[0].set(0.0)  # padding_idx=0
    scale = 1.0 / float(d_ff) ** 0.5
    layers = []
    k = 1
    for l in range(n_layers):
        d_in = d_model if l == 0 else d_ff
        w_ih = jax.random.uniform(keys[k], (4 * d_ff, d_in), jnp.float32, -scale, scale); k += 1
        w_hh = jax.random.uniform(keys[k], (4 * d_ff, d_ff), jnp.float32, -scale, scale); k += 1
        b_ih = jax.random.uniform(keys[k], (4 * d_ff,), jnp.float32, -scale, scale); k += 1
        b_hh = jax.random.uniform(keys[k], (4 * d_ff,), jnp.float32, -scale, scale); k += 1
        layers.append({"w_ih": w_ih, "w_hh": w_hh, "b_ih": b_ih, "b_hh": b_hh})
    return emb, layers


def decoder_forward(emb, layers, dec_inputs, h, c):
    """dec_inputs: (B, T) int32; h, c: (n_layers, B, d_ff) float32.
    Returns (dec_outputs (B, T, d_ff), (h, c)) — matches the PyTorch module."""
    B, T = dec_inputs.shape
    L = len(layers)
    H = layers[0]["w_hh"].shape[1]
    d_model = emb.shape[1]
    Bp = _round_up(max(B, 8), 8)          # pad batch to f32 sublane height

    # Embedding gather is glue (plain JAX); kernel handles the recurrence.
    x = jnp.take(emb, dec_inputs, axis=0)                       # (B, T, d_model)
    x_tm = jnp.transpose(x, (1, 0, 2))                          # (T, B, d_model)
    x_pad = jnp.pad(x_tm, ((0, 0), (0, Bp - B), (0, 0)))        # (T, Bp, d_model)
    x_flat = x_pad.reshape(T * Bp, d_model)

    # One packed state slab: [h0 per layer; c0 per layer], batch padded.
    h_pad = jnp.pad(h, ((0, 0), (0, Bp - B), (0, 0)))           # (L, Bp, H)
    c_pad = jnp.pad(c, ((0, 0), (0, Bp - B), (0, 0)))
    state0 = jnp.concatenate([h_pad, c_pad], axis=0)            # (2L, Bp, H)

    # PyTorch gate order [i, f, g, o] -> kernel order [i, f, o, g].
    def reorder(w):
        return jnp.concatenate([w[:H], w[H:2 * H], w[3 * H:], w[2 * H:3 * H]],
                               axis=0)

    # One packed weight slab for all layers (cuts DMA descriptor count).
    sections, layer_offsets, off = [], [], 0
    for l, p in enumerate(layers):
        din = d_model if l == 0 else H
        sec_rows = _round_up(din + H + 1, 8)
        layer_offsets.append(off)
        wih_t = reorder(p["w_ih"]).T                            # (din, 4H)
        whh_t = reorder(p["w_hh"]).T                            # (H, 4H)
        b = reorder(p["b_ih"] + p["b_hh"]).reshape(1, 4 * H)
        pad = jnp.zeros((sec_rows - (din + H + 1), 4 * H), jnp.float32)
        sections.append(jnp.concatenate([wih_t, whh_t, b, pad], axis=0))
        off += sec_rows
    w_slab = jnp.concatenate(sections, axis=0)                  # (off, 4H)

    out = decoder_lstm_pallas(x_flat, state0, w_slab, n_layers=L, T=T, Bp=Bp,
                              H=H, d_model=d_model,
                              layer_offsets=tuple(layer_offsets))

    dec_outputs = jnp.transpose(out[:T, :B, :], (1, 0, 2))      # (B, T, H)
    h_T = out[T:T + L, :B, :]
    c_T = out[T + L:T + 2 * L, :B, :]
    return dec_outputs, (h_T, c_T)


# --------------------------- pure-JAX reference ------------------------------

def decoder_ref(emb, layers, dec_inputs, h, c):
    x = jnp.take(emb, dec_inputs, axis=0)
    h_out, c_out = [], []
    for l, p in enumerate(layers):
        w_ih, w_hh = p["w_ih"], p["w_hh"]
        b = p["b_ih"] + p["b_hh"]
        H = w_hh.shape[1]

        def step(carry, x_t):
            h_t, c_t = carry
            gates = x_t @ w_ih.T + h_t @ w_hh.T + b
            i = jax.nn.sigmoid(gates[:, :H])
            f = jax.nn.sigmoid(gates[:, H:2 * H])
            g = jnp.tanh(gates[:, 2 * H:3 * H])
            o = jax.nn.sigmoid(gates[:, 3 * H:])
            c_n = f * c_t + i * g
            h_n = o * jnp.tanh(c_n)
            return (h_n, c_n), h_n

        (hT, cT), ys = jax.lax.scan(step, (h[l], c[l]),
                                    jnp.transpose(x, (1, 0, 2)))
        x = jnp.transpose(ys, (1, 0, 2))
        h_out.append(hT)
        c_out.append(cT)
    return x, (jnp.stack(h_out), jnp.stack(c_out))


# --------------------------------- main --------------------------------------

if __name__ == "__main__":
    B, T = 2, 8
    tgt_vocab_size = 16
    d_model = 32          # corpora.hp.hidden_units
    d_ff = 32             # corpora.hp.feed_forward_units
    n_layers = 2          # corpora.hp.num_lstm_layers

    key = jax.random.PRNGKey(0)
    k_par, k_tok, k_h, k_c = jax.random.split(key, 4)

    emb, layers = init_decoder_params(k_par, tgt_vocab_size, d_model, d_ff, n_layers)
    dec_inputs = jax.random.randint(k_tok, (B, T), 0, tgt_vocab_size, dtype=jnp.int32)
    h0 = 0.1 * jax.random.normal(k_h, (n_layers, B, d_ff), jnp.float32)
    c0 = 0.1 * jax.random.normal(k_c, (n_layers, B, d_ff), jnp.float32)

    dec_out, (h_T, c_T) = decoder_forward(emb, layers, dec_inputs, h0, c0)
    jax.block_until_ready((dec_out, h_T, c_T))

    ref_out, (ref_h, ref_c) = decoder_ref(emb, layers, dec_inputs, h0, c0)
    assert dec_out.shape == (B, T, d_ff)
    assert h_T.shape == (n_layers, B, d_ff) and c_T.shape == (n_layers, B, d_ff)
    assert jnp.allclose(dec_out, ref_out, atol=1e-5)
    assert jnp.allclose(h_T, ref_h, atol=1e-5)
    assert jnp.allclose(c_T, ref_c, atol=1e-5)

    print("KERNEL_OK")
</pallas_src>

<mosaic_0001>
module attributes {stable_mosaic.version = 11 : i64} {
  func.func @kernel(%arg0: memref<64x32xf32, #tpu.memory_space<vmem>>, %arg1: memref<4x8x32xf32, #tpu.memory_space<vmem>>, %arg2: memref<144x128xf32, #tpu.memory_space<vmem>>, %arg3: memref<12x8x32xf32, #tpu.memory_space<vmem>>) attributes {dimension_semantics = [], scalar_prefetch = 0 : i64, scratch_operands = 0 : i64, tpu.core_type = #tpu.core_type<tc>} {
    %c0 = arith.constant 0 : index
    %c0_0 = arith.constant 0 : index
    %0 = vector.load %arg2[%c0, %c0_0] : memref<144x128xf32, #tpu.memory_space<vmem>>, vector<32x128xf32>
    %c32 = arith.constant 32 : index
    %c0_1 = arith.constant 0 : index
    %1 = vector.load %arg2[%c32, %c0_1] : memref<144x128xf32, #tpu.memory_space<vmem>>, vector<32x128xf32>
    %c64 = arith.constant 64 : index
    %c0_2 = arith.constant 0 : index
    %2 = vector.load %arg2[%c64, %c0_2] : memref<144x128xf32, #tpu.memory_space<vmem>>, vector<1x128xf32>
    %c72 = arith.constant 72 : index
    %c0_3 = arith.constant 0 : index
    %3 = vector.load %arg2[%c72, %c0_3] : memref<144x128xf32, #tpu.memory_space<vmem>>, vector<32x128xf32>
    %c104 = arith.constant 104 : index
    %c0_4 = arith.constant 0 : index
    %4 = vector.load %arg2[%c104, %c0_4] : memref<144x128xf32, #tpu.memory_space<vmem>>, vector<32x128xf32>
    %c136 = arith.constant 136 : index
    %c0_5 = arith.constant 0 : index
    %5 = vector.load %arg2[%c136, %c0_5] : memref<144x128xf32, #tpu.memory_space<vmem>>, vector<1x128xf32>
    %6 = vector.shape_cast %5 : vector<1x128xf32> to vector<1x128xf32>
    %7 = vector.broadcast %6 : vector<1x128xf32> to vector<8x128xf32>
    %c0_6 = arith.constant 0 : index
    %c0_7 = arith.constant 0 : index
    %8 = vector.load %arg0[%c0_6, %c0_7] : memref<64x32xf32, #tpu.memory_space<vmem>>, vector<64x32xf32>
    %cst = arith.constant dense<0.000000e+00> : vector<64x128xf32>
    %9 = tpu.matmul %8, %0, %cst {dimension_numbers = #tpu.dot_dimension_numbers<[1], [0], [0], [1], [0, 0, 1, 1], [], []>} : vector<64x32xf32>, vector<32x128xf32>, vector<64x128xf32> -> vector<64x128xf32>
    %10 = vector.broadcast %2 : vector<1x128xf32> to vector<64x128xf32>
    %11 = arith.addf %9, %10 : vector<64x128xf32>
    %c0_8 = arith.constant 0 : index
    %c0_9 = arith.constant 0 : index
    %c0_10 = arith.constant 0 : index
    %12 = vector.load %arg1[%c0_8, %c0_9, %c0_10] : memref<4x8x32xf32, #tpu.memory_space<vmem>>, vector<1x8x32xf32>
    %13 = vector.shape_cast %12 : vector<1x8x32xf32> to vector<8x32xf32>
    %c1 = arith.constant 1 : index
    %c0_11 = arith.constant 0 : index
    %c0_12 = arith.constant 0 : index
    %14 = vector.load %arg1[%c1, %c0_11, %c0_12] : memref<4x8x32xf32, #tpu.memory_space<vmem>>, vector<1x8x32xf32>
    %15 = vector.shape_cast %14 : vector<1x8x32xf32> to vector<8x32xf32>
    %c2 = arith.constant 2 : index
    %c0_13 = arith.constant 0 : index
    %c0_14 = arith.constant 0 : index
    %16 = vector.load %arg1[%c2, %c0_13, %c0_14] : memref<4x8x32xf32, #tpu.memory_space<vmem>>, vector<1x8x32xf32>
    %17 = vector.shape_cast %16 : vector<1x8x32xf32> to vector<8x32xf32>
    %c3 = arith.constant 3 : index
    %c0_15 = arith.constant 0 : index
    %c0_16 = arith.constant 0 : index
    %18 = vector.load %arg1[%c3, %c0_15, %c0_16] : memref<4x8x32xf32, #tpu.memory_space<vmem>>, vector<1x8x32xf32>
    %19 = vector.shape_cast %18 : vector<1x8x32xf32> to vector<8x32xf32>
    %20 = vector.extract_strided_slice %11 {offsets = [0, 0], sizes = [8, 128], strides = [1, 1]} : vector<64x128xf32> to vector<8x128xf32>
    %cst_17 = arith.constant dense<0.000000e+00> : vector<8x128xf32>
    %21 = tpu.matmul %13, %1, %cst_17 {dimension_numbers = #tpu.dot_dimension_numbers<[1], [0], [0], [1], [0, 0, 1, 1], [], []>} : vector<8x32xf32>, vector<32x128xf32>, vector<8x128xf32> -> vector<8x128xf32>
    %22 = arith.addf %20, %21 : vector<8x128xf32>
    %23 = vector.extract_strided_slice %22 {offsets = [0, 0], sizes = [8, 96], strides = [1, 1]} : vector<8x128xf32> to vector<8x96xf32>
    %24 = arith.negf %23 : vector<8x96xf32>
    %25 = math.exp %24 : vector<8x96xf32>
    %cst_18 = arith.constant 1.000000e+00 : f32
    %26 = vector.broadcast %cst_18 : f32 to vector<8x96xf32>
    %27 = arith.addf %26, %25 : vector<8x96xf32>
    %28 = arith.divf %26, %27 : vector<8x96xf32>
    %29 = vector.extract_strided_slice %28 {offsets = [0, 0], sizes = [8, 32], strides = [1, 1]} : vector<8x96xf32> to vector<8x32xf32>
    %30 = vector.extract_strided_slice %28 {offsets = [0, 32], sizes = [8, 32], strides = [1, 1]} : vector<8x96xf32> to vector<8x32xf32>
    %31 = vector.extract_strided_slice %28 {offsets = [0, 64], sizes = [8, 32], strides = [1, 1]} : vector<8x96xf32> to vector<8x32xf32>
    %32 = vector.extract_strided_slice %22 {offsets = [0, 96], sizes = [8, 32], strides = [1, 1]} : vector<8x128xf32> to vector<8x32xf32>
    %33 = math.tanh %32 : vector<8x32xf32>
    %34 = arith.mulf %30, %17 : vector<8x32xf32>
    %35 = arith.mulf %29, %33 : vector<8x32xf32>
    %36 = arith.addf %34, %35 : vector<8x32xf32>
    %37 = math.tanh %36 : vector<8x32xf32>
    %38 = arith.mulf %31, %37 : vector<8x32xf32>
    %cst_19 = arith.constant dense<0.000000e+00> : vector<8x128xf32>
    %39 = tpu.matmul %38, %3, %cst_19 {dimension_numbers = #tpu.dot_dimension_numbers<[1], [0], [0], [1], [0, 0, 1, 1], [], []>} : vector<8x32xf32>, vector<32x128xf32>, vector<8x128xf32> -> vector<8x128xf32>
    %cst_20 = arith.constant dense<0.000000e+00> : vector<8x128xf32>
    %40 = tpu.matmul %15, %4, %cst_20 {dimension_numbers = #tpu.dot_dimension_numbers<[1], [0], [0], [1], [0, 0, 1, 1], [], []>} : vector<8x32xf32>, vector<32x128xf32>, vector<8x128xf32> -> vector<8x128xf32>
    %41 = arith.addf %39, %40 : vector<8x128xf32>
    %42 = arith.addf %41, %7 : vector<8x128xf32>
    %43 = vector.extract_strided_slice %42 {offsets = [0, 0], sizes = [8, 96], strides = [1, 1]} : vector<8x128xf32> to vector<8x96xf32>
    %44 = arith.negf %43 : vector<8x96xf32>
    %45 = math.exp %44 : vector<8x96xf32>
    %cst_21 = arith.constant 1.000000e+00 : f32
    %46 = vector.broadcast %cst_21 : f32 to vector<8x96xf32>
    %47 = arith.addf %46, %45 : vector<8x96xf32>
    %48 = arith.divf %46, %47 : vector<8x96xf32>
    %49 = vector.extract_strided_slice %48 {offsets = [0, 0], sizes = [8, 32], strides = [1, 1]} : vector<8x96xf32> to vector<8x32xf32>
    %50 = vector.extract_strided_slice %48 {offsets = [0, 32], sizes = [8, 32], strides = [1, 1]} : vector<8x96xf32> to vector<8x32xf32>
    %51 = vector.extract_strided_slice %48 {offsets = [0, 64], sizes = [8, 32], strides = [1, 1]} : vector<8x96xf32> to vector<8x32xf32>
    %52 = vector.extract_strided_slice %42 {offsets = [0, 96], sizes = [8, 32], strides = [1, 1]} : vector<8x128xf32> to vector<8x32xf32>
    %53 = math.tanh %52 : vector<8x32xf32>
    %54 = arith.mulf %50, %19 : vector<8x32xf32>
    %55 = arith.mulf %49, %53 : vector<8x32xf32>
    %56 = arith.addf %54, %55 : vector<8x32xf32>
    %57 = math.tanh %56 : vector<8x32xf32>
    %58 = arith.mulf %51, %57 : vector<8x32xf32>
    %c0_22 = arith.constant 0 : index
    %c0_23 = arith.constant 0 : index
    %c0_24 = arith.constant 0 : index
    %59 = vector.load %arg3[%c0_22, %c0_23, %c0_24] : memref<12x8x32xf32, #tpu.memory_space<vmem>>, vector<1x8x32xf32>
    %60 = vector.shape_cast %59 : vector<1x8x32xf32> to vector<8x32xf32>
    %61 = vector.shape_cast %58 : vector<8x32xf32> to vector<1x8x32xf32>
    tpu.vector_store %arg3[%c0_22, %c0_23, %c0_24], %61 {strides = array<i32>} : memref<12x8x32xf32, #tpu.memory_space<vmem>>, vector<1x8x32xf32>,
    %62 = vector.extract_strided_slice %11 {offsets = [8, 0], sizes = [8, 128], strides = [1, 1]} : vector<64x128xf32> to vector<8x128xf32>
    %cst_25 = arith.constant dense<0.000000e+00> : vector<8x128xf32>
    %63 = tpu.matmul %38, %1, %cst_25 {dimension_numbers = #tpu.dot_dimension_numbers<[1], [0], [0], [1], [0, 0, 1, 1], [], []>} : vector<8x32xf32>, vector<32x128xf32>, vector<8x128xf32> -> vector<8x128xf32>
    %64 = arith.addf %62, %63 : vector<8x128xf32>
    %65 = vector.extract_strided_slice %64 {offsets = [0, 0], sizes = [8, 96], strides = [1, 1]} : vector<8x128xf32> to vector<8x96xf32>
    %66 = arith.negf %65 : vector<8x96xf32>
    %67 = math.exp %66 : vector<8x96xf32>
    %cst_26 = arith.constant 1.000000e+00 : f32
    %68 = vector.broadcast %cst_26 : f32 to vector<8x96xf32>
    %69 = arith.addf %68, %67 : vector<8x96xf32>
    %70 = arith.divf %68, %69 : vector<8x96xf32>
    %71 = vector.extract_strided_slice %70 {offsets = [0, 0], sizes = [8, 32], strides = [1, 1]} : vector<8x96xf32> to vector<8x32xf32>
    %72 = vector.extract_strided_slice %70 {offsets = [0, 32], sizes = [8, 32], strides = [1, 1]} : vector<8x96xf32> to vector<8x32xf32>
    %73 = vector.extract_strided_slice %70 {offsets = [0, 64], sizes = [8, 32], strides = [1, 1]} : vector<8x96xf32> to vector<8x32xf32>
    %74 = vector.extract_strided_slice %64 {offsets = [0, 96], sizes = [8, 32], strides = [1, 1]} : vector<8x128xf32> to vector<8x32xf32>
    %75 = math.tanh %74 : vector<8x32xf32>
    %76 = arith.mulf %72, %36 : vector<8x32xf32>
    %77 = arith.mulf %71, %75 : vector<8x32xf32>
    %78 = arith.addf %76, %77 : vector<8x32xf32>
    %79 = math.tanh %78 : vector<8x32xf32>
    %80 = arith.mulf %73, %79 : vector<8x32xf32>
    %cst_27 = arith.constant dense<0.000000e+00> : vector<8x128xf32>
    %81 = tpu.matmul %80, %3, %cst_27 {dimension_numbers = #tpu.dot_dimension_numbers<[1], [0], [0], [1], [0, 0, 1, 1], [], []>} : vector<8x32xf32>, vector<32x128xf32>, vector<8x128xf32> -> vector<8x128xf32>
    %cst_28 = arith.constant dense<0.000000e+00> : vector<8x128xf32>
    %82 = tpu.matmul %58, %4, %cst_28 {dimension_numbers = #tpu.dot_dimension_numbers<[1], [0], [0], [1], [0, 0, 1, 1], [], []>} : vector<8x32xf32>, vector<32x128xf32>, vector<8x128xf32> -> vector<8x128xf32>
    %83 = arith.addf %81, %82 : vector<8x128xf32>
    %84 = arith.addf %83, %7 : vector<8x128xf32>
    %85 = vector.extract_strided_slice %84 {offsets = [0, 0], sizes = [8, 96], strides = [1, 1]} : vector<8x128xf32> to vector<8x96xf32>
    %86 = arith.negf %85 : vector<8x96xf32>
    %87 = math.exp %86 : vector<8x96xf32>
    %cst_29 = arith.constant 1.000000e+00 : f32
    %88 = vector.broadcast %cst_29 : f32 to vector<8x96xf32>
    %89 = arith.addf %88, %87 : vector<8x96xf32>
    %90 = arith.divf %88, %89 : vector<8x96xf32>
    %91 = vector.extract_strided_slice %90 {offsets = [0, 0], sizes = [8, 32], strides = [1, 1]} : vector<8x96xf32> to vector<8x32xf32>
    %92 = vector.extract_strided_slice %90 {offsets = [0, 32], sizes = [8, 32], strides = [1, 1]} : vector<8x96xf32> to vector<8x32xf32>
    %93 = vector.extract_strided_slice %90 {offsets = [0, 64], sizes = [8, 32], strides = [1, 1]} : vector<8x96xf32> to vector<8x32xf32>
    %94 = vector.extract_strided_slice %84 {offsets = [0, 96], sizes = [8, 32], strides = [1, 1]} : vector<8x128xf32> to vector<8x32xf32>
    %95 = math.tanh %94 : vector<8x32xf32>
    %96 = arith.mulf %92, %56 : vector<8x32xf32>
    %97 = arith.mulf %91, %95 : vector<8x32xf32>
    %98 = arith.addf %96, %97 : vector<8x32xf32>
    %99 = math.tanh %98 : vector<8x32xf32>
    %100 = arith.mulf %93, %99 : vector<8x32xf32>
    %c1_30 = arith.constant 1 : index
    %c0_31 = arith.constant 0 : index
    %c0_32 = arith.constant 0 : index
    %101 = vector.load %arg3[%c1_30, %c0_31, %c0_32] : memref<12x8x32xf32, #tpu.memory_space<vmem>>, vector<1x8x32xf32>
    %102 = vector.shape_cast %101 : vector<1x8x32xf32> to vector<8x32xf32>
    %103 = vector.shape_cast %100 : vector<8x32xf32> to vector<1x8x32xf32>
    tpu.vector_store %arg3[%c1_30, %c0_31, %c0_32], %103 {strides = array<i32>} : memref<12x8x32xf32, #tpu.memory_space<vmem>>, vector<1x8x32xf32>,
    %104 = vector.extract_strided_slice %11 {offsets = [16, 0], sizes = [8, 128], strides = [1, 1]} : vector<64x128xf32> to vector<8x128xf32>
    %cst_33 = arith.constant dense<0.000000e+00> : vector<8x128xf32>
    %105 = tpu.matmul %80, %1, %cst_33 {dimension_numbers = #tpu.dot_dimension_numbers<[1], [0], [0], [1], [0, 0, 1, 1], [], []>} : vector<8x32xf32>, vector<32x128xf32>, vector<8x128xf32> -> vector<8x128xf32>
    %106 = arith.addf %104, %105 : vector<8x128xf32>
    %107 = vector.extract_strided_slice %106 {offsets = [0, 0], sizes = [8, 96], strides = [1, 1]} : vector<8x128xf32> to vector<8x96xf32>
    %108 = arith.negf %107 : vector<8x96xf32>
    %109 = math.exp %108 : vector<8x96xf32>
    %cst_34 = arith.constant 1.000000e+00 : f32
    %110 = vector.broadcast %cst_34 : f32 to vector<8x96xf32>
    %111 = arith.addf %110, %109 : vector<8x96xf32>
    %112 = arith.divf %110, %111 : vector<8x96xf32>
    %113 = vector.extract_strided_slice %112 {offsets = [0, 0], sizes = [8, 32], strides = [1, 1]} : vector<8x96xf32> to vector<8x32xf32>
    %114 = vector.extract_strided_slice %112 {offsets = [0, 32], sizes = [8, 32], strides = [1, 1]} : vector<8x96xf32> to vector<8x32xf32>
    %115 = vector.extract_strided_slice %112 {offsets = [0, 64], sizes = [8, 32], strides = [1, 1]} : vector<8x96xf32> to vector<8x32xf32>
    %116 = vector.extract_strided_slice %106 {offsets = [0, 96], sizes = [8, 32], strides = [1, 1]} : vector<8x128xf32> to vector<8x32xf32>
    %117 = math.tanh %116 : vector<8x32xf32>
    %118 = arith.mulf %114, %78 : vector<8x32xf32>
    %119 = arith.mulf %113, %117 : vector<8x32xf32>
    %120 = arith.addf %118, %119 : vector<8x32xf32>
    %121 = math.tanh %120 : vector<8x32xf32>
    %122 = arith.mulf %115, %121 : vector<8x32xf32>
    %cst_35 = arith.constant dense<0.000000e+00> : vector<8x128xf32>
    %123 = tpu.matmul %122, %3, %cst_35 {dimension_numbers = #tpu.dot_dimension_numbers<[1], [0], [0], [1], [0, 0, 1, 1], [], []>} : vector<8x32xf32>, vector<32x128xf32>, vector<8x128xf32> -> vector<8x128xf32>
    %cst_36 = arith.constant dense<0.000000e+00> : vector<8x128xf32>
    %124 = tpu.matmul %100, %4, %cst_36 {dimension_numbers = #tpu.dot_dimension_numbers<[1], [0], [0], [1], [0, 0, 1, 1], [], []>} : vector<8x32xf32>, vector<32x128xf32>, vector<8x128xf32> -> vector<8x128xf32>
    %125 = arith.addf %123, %124 : vector<8x128xf32>
    %126 = arith.addf %125, %7 : vector<8x128xf32>
    %127 = vector.extract_strided_slice %126 {offsets = [0, 0], sizes = [8, 96], strides = [1, 1]} : vector<8x128xf32> to vector<8x96xf32>
    %128 = arith.negf %127 : vector<8x96xf32>
    %129 = math.exp %128 : vector<8x96xf32>
    %cst_37 = arith.constant 1.000000e+00 : f32
    %130 = vector.broadcast %cst_37 : f32 to vector<8x96xf32>
    %131 = arith.addf %130, %129 : vector<8x96xf32>
    %132 = arith.divf %130, %131 : vector<8x96xf32>
    %133 = vector.extract_strided_slice %132 {offsets = [0, 0], sizes = [8, 32], strides = [1, 1]} : vector<8x96xf32> to vector<8x32xf32>
    %134 = vector.extract_strided_slice %132 {offsets = [0, 32], sizes = [8, 32], strides = [1, 1]} : vector<8x96xf32> to vector<8x32xf32>
    %135 = vector.extract_strided_slice %132 {offsets = [0, 64], sizes = [8, 32], strides = [1, 1]} : vector<8x96xf32> to vector<8x32xf32>
    %136 = vector.extract_strided_slice %126 {offsets = [0, 96], sizes = [8, 32], strides = [1, 1]} : vector<8x128xf32> to vector<8x32xf32>
    %137 = math.tanh %136 : vector<8x32xf32>
    %138 = arith.mulf %134, %98 : vector<8x32xf32>
    %139 = arith.mulf %133, %137 : vector<8x32xf32>
    %140 = arith.addf %138, %139 : vector<8x32xf32>
    %141 = math.tanh %140 : vector<8x32xf32>
    %142 = arith.mulf %135, %141 : vector<8x32xf32>
    %c2_38 = arith.constant 2 : index
    %c0_39 = arith.constant 0 : index
    %c0_40 = arith.constant 0 : index
    %143 = vector.load %arg3[%c2_38, %c0_39, %c0_40] : memref<12x8x32xf32, #tpu.memory_space<vmem>>, vector<1x8x32xf32>
    %144 = vector.shape_cast %143 : vector<1x8x32xf32> to vector<8x32xf32>
    %145 = vector.shape_cast %142 : vector<8x32xf32> to vector<1x8x32xf32>
    tpu.vector_store %arg3[%c2_38, %c0_39, %c0_40], %145 {strides = array<i32>} : memref<12x8x32xf32, #tpu.memory_space<vmem>>, vector<1x8x32xf32>,
    %146 = vector.extract_strided_slice %11 {offsets = [24, 0], sizes = [8, 128], strides = [1, 1]} : vector<64x128xf32> to vector<8x128xf32>
    %cst_41 = arith.constant dense<0.000000e+00> : vector<8x128xf32>
    %147 = tpu.matmul %122, %1, %cst_41 {dimension_numbers = #tpu.dot_dimension_numbers<[1], [0], [0], [1], [0, 0, 1, 1], [], []>} : vector<8x32xf32>, vector<32x128xf32>, vector<8x128xf32> -> vector<8x128xf32>
    %148 = arith.addf %146, %147 : vector<8x128xf32>
    %149 = vector.extract_strided_slice %148 {offsets = [0, 0], sizes = [8, 96], strides = [1, 1]} : vector<8x128xf32> to vector<8x96xf32>
    %150 = arith.negf %149 : vector<8x96xf32>
    %151 = math.exp %150 : vector<8x96xf32>
    %cst_42 = arith.constant 1.000000e+00 : f32
    %152 = vector.broadcast %cst_42 : f32 to vector<8x96xf32>
    %153 = arith.addf %152, %151 : vector<8x96xf32>
    %154 = arith.divf %152, %153 : vector<8x96xf32>
    %155 = vector.extract_strided_slice %154 {offsets = [0, 0], sizes = [8, 32], strides = [1, 1]} : vector<8x96xf32> to vector<8x32xf32>
    %156 = vector.extract_strided_slice %154 {offsets = [0, 32], sizes = [8, 32], strides = [1, 1]} : vector<8x96xf32> to vector<8x32xf32>
    %157 = vector.extract_strided_slice %154 {offsets = [0, 64], sizes = [8, 32], strides = [1, 1]} : vector<8x96xf32> to vector<8x32xf32>
    %158 = vector.extract_strided_slice %148 {offsets = [0, 96], sizes = [8, 32], strides = [1, 1]} : vector<8x128xf32> to vector<8x32xf32>
    %159 = math.tanh %158 : vector<8x32xf32>
    %160 = arith.mulf %156, %120 : vector<8x32xf32>
    %161 = arith.mulf %155, %159 : vector<8x32xf32>
    %162 = arith.addf %160, %161 : vector<8x32xf32>
    %163 = math.tanh %162 : vector<8x32xf32>
    %164 = arith.mulf %157, %163 : vector<8x32xf32>
    %cst_43 = arith.constant dense<0.000000e+00> : vector<8x128xf32>
    %165 = tpu.matmul %164, %3, %cst_43 {dimension_numbers = #tpu.dot_dimension_numbers<[1], [0], [0], [1], [0, 0, 1, 1], [], []>} : vector<8x32xf32>, vector<32x128xf32>, vector<8x128xf32> -> vector<8x128xf32>
    %cst_44 = arith.constant dense<0.000000e+00> : vector<8x128xf32>
    %166 = tpu.matmul %142, %4, %cst_44 {dimension_numbers = #tpu.dot_dimension_numbers<[1], [0], [0], [1], [0, 0, 1, 1], [], []>} : vector<8x32xf32>, vector<32x128xf32>, vector<8x128xf32> -> vector<8x128xf32>
    %167 = arith.addf %165, %166 : vector<8x128xf32>
    %168 = arith.addf %167, %7 : vector<8x128xf32>
    %169 = vector.extract_strided_slice %168 {offsets = [0, 0], sizes = [8, 96], strides = [1, 1]} : vector<8x128xf32> to vector<8x96xf32>
    %170 = arith.negf %169 : vector<8x96xf32>
    %171 = math.exp %170 : vector<8x96xf32>
    %cst_45 = arith.constant 1.000000e+00 : f32
    %172 = vector.broadcast %cst_45 : f32 to vector<8x96xf32>
    %173 = arith.addf %172, %171 : vector<8x96xf32>
    %174 = arith.divf %172, %173 : vector<8x96xf32>
    %175 = vector.extract_strided_slice %174 {offsets = [0, 0], sizes = [8, 32], strides = [1, 1]} : vector<8x96xf32> to vector<8x32xf32>
    %176 = vector.extract_strided_slice %174 {offsets = [0, 32], sizes = [8, 32], strides = [1, 1]} : vector<8x96xf32> to vector<8x32xf32>
    %177 = vector.extract_strided_slice %174 {offsets = [0, 64], sizes = [8, 32], strides = [1, 1]} : vector<8x96xf32> to vector<8x32xf32>
    %178 = vector.extract_strided_slice %168 {offsets = [0, 96], sizes = [8, 32], strides = [1, 1]} : vector<8x128xf32> to vector<8x32xf32>
    %179 = math.tanh %178 : vector<8x32xf32>
    %180 = arith.mulf %176, %140 : vector<8x32xf32>
    %181 = arith.mulf %175, %179 : vector<8x32xf32>
    %182 = arith.addf %180, %181 : vector<8x32xf32>
    %183 = math.tanh %182 : vector<8x32xf32>
    %184 = arith.mulf %177, %183 : vector<8x32xf32>
    %c3_46 = arith.constant 3 : index
    %c0_47 = arith.constant 0 : index
    %c0_48 = arith.constant 0 : index
    %185 = vector.load %arg3[%c3_46, %c0_47, %c0_48] : memref<12x8x32xf32, #tpu.memory_space<vmem>>, vector<1x8x32xf32>
    %186 = vector.shape_cast %185 : vector<1x8x32xf32> to vector<8x32xf32>
    %187 = vector.shape_cast %184 : vector<8x32xf32> to vector<1x8x32xf32>
    tpu.vector_store %arg3[%c3_46, %c0_47, %c0_48], %187 {strides = array<i32>} : memref<12x8x32xf32, #tpu.memory_space<vmem>>, vector<1x8x32xf32>,
    %188 = vector.extract_strided_slice %11 {offsets = [32, 0], sizes = [8, 128], strides = [1, 1]} : vector<64x128xf32> to vector<8x128xf32>
    %cst_49 = arith.constant dense<0.000000e+00> : vector<8x128xf32>
    %189 = tpu.matmul %164, %1, %cst_49 {dimension_numbers = #tpu.dot_dimension_numbers<[1], [0], [0], [1], [0, 0, 1, 1], [], []>} : vector<8x32xf32>, vector<32x128xf32>, vector<8x128xf32> -> vector<8x128xf32>
    %190 = arith.addf %188, %189 : vector<8x128xf32>
    %191 = vector.extract_strided_slice %190 {offsets = [0, 0], sizes = [8, 96], strides = [1, 1]} : vector<8x128xf32> to vector<8x96xf32>
    %192 = arith.negf %191 : vector<8x96xf32>
    %193 = math.exp %192 : vector<8x96xf32>
    %cst_50 = arith.constant 1.000000e+00 : f32
    %194 = vector.broadcast %cst_50 : f32 to vector<8x96xf32>
    %195 = arith.addf %194, %193 : vector<8x96xf32>
    %196 = arith.divf %194, %195 : vector<8x96xf32>
    %197 = vector.extract_strided_slice %196 {offsets = [0, 0], sizes = [8, 32], strides = [1, 1]} : vector<8x96xf32> to vector<8x32xf32>
    %198 = vector.extract_strided_slice %196 {offsets = [0, 32], sizes = [8, 32], strides = [1, 1]} : vector<8x96xf32> to vector<8x32xf32>
    %199 = vector.extract_strided_slice %196 {offsets = [0, 64], sizes = [8, 32], strides = [1, 1]} : vector<8x96xf32> to vector<8x32xf32>
    %200 = vector.extract_strided_slice %190 {offsets = [0, 96], sizes = [8, 32], strides = [1, 1]} : vector<8x128xf32> to vector<8x32xf32>
    %201 = math.tanh %200 : vector<8x32xf32>
    %202 = arith.mulf %198, %162 : vector<8x32xf32>
    %203 = arith.mulf %197, %201 : vector<8x32xf32>
    %204 = arith.addf %202, %203 : vector<8x32xf32>
    %205 = math.tanh %204 : vector<8x32xf32>
    %206 = arith.mulf %199, %205 : vector<8x32xf32>
    %cst_51 = arith.constant dense<0.000000e+00> : vector<8x128xf32>
    %207 = tpu.matmul %206, %3, %cst_51 {dimension_numbers = #tpu.dot_dimension_numbers<[1], [0], [0], [1], [0, 0, 1, 1], [], []>} : vector<8x32xf32>, vector<32x128xf32>, vector<8x128xf32> -> vector<8x128xf32>
    %cst_52 = arith.constant dense<0.000000e+00> : vector<8x128xf32>
    %208 = tpu.matmul %184, %4, %cst_52 {dimension_numbers = #tpu.dot_dimension_numbers<[1], [0], [0], [1], [0, 0, 1, 1], [], []>} : vector<8x32xf32>, vector<32x128xf32>, vector<8x128xf32> -> vector<8x128xf32>
    %209 = arith.addf %207, %208 : vector<8x128xf32>
    %210 = arith.addf %209, %7 : vector<8x128xf32>
    %211 = vector.extract_strided_slice %210 {offsets = [0, 0], sizes = [8, 96], strides = [1, 1]} : vector<8x128xf32> to vector<8x96xf32>
    %212 = arith.negf %211 : vector<8x96xf32>
    %213 = math.exp %212 : vector<8x96xf32>
    %cst_53 = arith.constant 1.000000e+00 : f32
    %214 = vector.broadcast %cst_53 : f32 to vector<8x96xf32>
    %215 = arith.addf %214, %213 : vector<8x96xf32>
    %216 = arith.divf %214, %215 : vector<8x96xf32>
    %217 = vector.extract_strided_slice %216 {offsets = [0, 0], sizes = [8, 32], strides = [1, 1]} : vector<8x96xf32> to vector<8x32xf32>
    %218 = vector.extract_strided_slice %216 {offsets = [0, 32], sizes = [8, 32], strides = [1, 1]} : vector<8x96xf32> to vector<8x32xf32>
    %219 = vector.extract_strided_slice %216 {offsets = [0, 64], sizes = [8, 32], strides = [1, 1]} : vector<8x96xf32> to vector<8x32xf32>
    %220 = vector.extract_strided_slice %210 {offsets = [0, 96], sizes = [8, 32], strides = [1, 1]} : vector<8x128xf32> to vector<8x32xf32>
    %221 = math.tanh %220 : vector<8x32xf32>
    %222 = arith.mulf %218, %182 : vector<8x32xf32>
    %223 = arith.mulf %217, %221 : vector<8x32xf32>
    %224 = arith.addf %222, %223 : vector<8x32xf32>
    %225 = math.tanh %224 : vector<8x32xf32>
    %226 = arith.mulf %219, %225 : vector<8x32xf32>
    %c4 = arith.constant 4 : index
    %c0_54 = arith.constant 0 : index
    %c0_55 = arith.constant 0 : index
    %227 = vector.load %arg3[%c4, %c0_54, %c0_55] : memref<12x8x32xf32, #tpu.memory_space<vmem>>, vector<1x8x32xf32>
    %228 = vector.shape_cast %227 : vector<1x8x32xf32> to vector<8x32xf32>
    %229 = vector.shape_cast %226 : vector<8x32xf32> to vector<1x8x32xf32>
    tpu.vector_store %arg3[%c4, %c0_54, %c0_55], %229 {strides = array<i32>} : memref<12x8x32xf32, #tpu.memory_space<vmem>>, vector<1x8x32xf32>,
    %230 = vector.extract_strided_slice %11 {offsets = [40, 0], sizes = [8, 128], strides = [1, 1]} : vector<64x128xf32> to vector<8x128xf32>
    %cst_56 = arith.constant dense<0.000000e+00> : vector<8x128xf32>
    %231 = tpu.matmul %206, %1, %cst_56 {dimension_numbers = #tpu.dot_dimension_numbers<[1], [0], [0], [1], [0, 0, 1, 1], [], []>} : vector<8x32xf32>, vector<32x128xf32>, vector<8x128xf32> -> vector<8x128xf32>
    %232 = arith.addf %230, %231 : vector<8x128xf32>
    %233 = vector.extract_strided_slice %232 {offsets = [0, 0], sizes = [8, 96], strides = [1, 1]} : vector<8x128xf32> to vector<8x96xf32>
    %234 = arith.negf %233 : vector<8x96xf32>
    %235 = math.exp %234 : vector<8x96xf32>
    %cst_57 = arith.constant 1.000000e+00 : f32
    %236 = vector.broadcast %cst_57 : f32 to vector<8x96xf32>
    %237 = arith.addf %236, %235 : vector<8x96xf32>
    %238 = arith.divf %236, %237 : vector<8x96xf32>
    %239 = vector.extract_strided_slice %238 {offsets = [0, 0], sizes = [8, 32], strides = [1, 1]} : vector<8x96xf32> to vector<8x32xf32>
    %240 = vector.extract_strided_slice %238 {offsets = [0, 32], sizes = [8, 32], strides = [1, 1]} : vector<8x96xf32> to vector<8x32xf32>
    %241 = vector.extract_strided_slice %238 {offsets = [0, 64], sizes = [8, 32], strides = [1, 1]} : vector<8x96xf32> to vector<8x32xf32>
    %242 = vector.extract_strided_slice %232 {offsets = [0, 96], sizes = [8, 32], strides = [1, 1]} : vector<8x128xf32> to vector<8x32xf32>
    %243 = math.tanh %242 : vector<8x32xf32>
    %244 = arith.mulf %240, %204 : vector<8x32xf32>
    %245 = arith.mulf %239, %243 : vector<8x32xf32>
    %246 = arith.addf %244, %245 : vector<8x32xf32>
    %247 = math.tanh %246 : vector<8x32xf32>
    %248 = arith.mulf %241, %247 : vector<8x32xf32>
    %cst_58 = arith.constant dense<0.000000e+00> : vector<8x128xf32>
    %249 = tpu.matmul %248, %3, %cst_58 {dimension_numbers = #tpu.dot_dimension_numbers<[1], [0], [0], [1], [0, 0, 1, 1], [], []>} : vector<8x32xf32>, vector<32x128xf32>, vector<8x128xf32> -> vector<8x128xf32>
    %cst_59 = arith.constant dense<0.000000e+00> : vector<8x128xf32>
    %250 = tpu.matmul %226, %4, %cst_59 {dimension_numbers = #tpu.dot_dimension_numbers<[1], [0], [0], [1], [0, 0, 1, 1], [], []>} : vector<8x32xf32>, vector<32x128xf32>, vector<8x128xf32> -> vector<8x128xf32>
    %251 = arith.addf %249, %250 : vector<8x128xf32>
    %252 = arith.addf %251, %7 : vector<8x128xf32>
    %253 = vector.extract_strided_slice %252 {offsets = [0, 0], sizes = [8, 96], strides = [1, 1]} : vector<8x128xf32> to vector<8x96xf32>
    %254 = arith.negf %253 : vector<8x96xf32>
    %255 = math.exp %254 : vector<8x96xf32>
    %cst_60 = arith.constant 1.000000e+00 : f32
    %256 = vector.broadcast %cst_60 : f32 to vector<8x96xf32>
    %257 = arith.addf %256, %255 : vector<8x96xf32>
    %258 = arith.divf %256, %257 : vector<8x96xf32>
    %259 = vector.extract_strided_slice %258 {offsets = [0, 0], sizes = [8, 32], strides = [1, 1]} : vector<8x96xf32> to vector<8x32xf32>
    %260 = vector.extract_strided_slice %258 {offsets = [0, 32], sizes = [8, 32], strides = [1, 1]} : vector<8x96xf32> to vector<8x32xf32>
    %261 = vector.extract_strided_slice %258 {offsets = [0, 64], sizes = [8, 32], strides = [1, 1]} : vector<8x96xf32> to vector<8x32xf32>
    %262 = vector.extract_strided_slice %252 {offsets = [0, 96], sizes = [8, 32], strides = [1, 1]} : vector<8x128xf32> to vector<8x32xf32>
    %263 = math.tanh %262 : vector<8x32xf32>
    %264 = arith.mulf %260, %224 : vector<8x32xf32>
    %265 = arith.mulf %259, %263 : vector<8x32xf32>
    %266 = arith.addf %264, %265 : vector<8x32xf32>
    %267 = math.tanh %266 : vector<8x32xf32>
    %268 = arith.mulf %261, %267 : vector<8x32xf32>
    %c5 = arith.constant 5 : index
    %c0_61 = arith.constant 0 : index
    %c0_62 = arith.constant 0 : index
    %269 = vector.load %arg3[%c5, %c0_61, %c0_62] : memref<12x8x32xf32, #tpu.memory_space<vmem>>, vector<1x8x32xf32>
    %270 = vector.shape_cast %269 : vector<1x8x32xf32> to vector<8x32xf32>
    %271 = vector.shape_cast %268 : vector<8x32xf32> to vector<1x8x32xf32>
    tpu.vector_store %arg3[%c5, %c0_61, %c0_62], %271 {strides = array<i32>} : memref<12x8x32xf32, #tpu.memory_space<vmem>>, vector<1x8x32xf32>,
    %272 = vector.extract_strided_slice %11 {offsets = [48, 0], sizes = [8, 128], strides = [1, 1]} : vector<64x128xf32> to vector<8x128xf32>
    %cst_63 = arith.constant dense<0.000000e+00> : vector<8x128xf32>
    %273 = tpu.matmul %248, %1, %cst_63 {dimension_numbers = #tpu.dot_dimension_numbers<[1], [0], [0], [1], [0, 0, 1, 1], [], []>} : vector<8x32xf32>, vector<32x128xf32>, vector<8x128xf32> -> vector<8x128xf32>
    %274 = arith.addf %272, %273 : vector<8x128xf32>
    %275 = vector.extract_strided_slice %274 {offsets = [0, 0], sizes = [8, 96], strides = [1, 1]} : vector<8x128xf32> to vector<8x96xf32>
    %276 = arith.negf %275 : vector<8x96xf32>
    %277 = math.exp %276 : vector<8x96xf32>
    %cst_64 = arith.constant 1.000000e+00 : f32
    %278 = vector.broadcast %cst_64 : f32 to vector<8x96xf32>
    %279 = arith.addf %278, %277 : vector<8x96xf32>
    %280 = arith.divf %278, %279 : vector<8x96xf32>
    %281 = vector.extract_strided_slice %280 {offsets = [0, 0], sizes = [8, 32], strides = [1, 1]} : vector<8x96xf32> to vector<8x32xf32>
    %282 = vector.extract_strided_slice %280 {offsets = [0, 32], sizes = [8, 32], strides = [1, 1]} : vector<8x96xf32> to vector<8x32xf32>
    %283 = vector.extract_strided_slice %280 {offsets = [0, 64], sizes = [8, 32], strides = [1, 1]} : vector<8x96xf32> to vector<8x32xf32>
    %284 = vector.extract_strided_slice %274 {offsets = [0, 96], sizes = [8, 32], strides = [1, 1]} : vector<8x128xf32> to vector<8x32xf32>
    %285 = math.tanh %284 : vector<8x32xf32>
    %286 = arith.mulf %282, %246 : vector<8x32xf32>
    %287 = arith.mulf %281, %285 : vector<8x32xf32>
    %288 = arith.addf %286, %287 : vector<8x32xf32>
    %289 = math.tanh %288 : vector<8x32xf32>
    %290 = arith.mulf %283, %289 : vector<8x32xf32>
    %cst_65 = arith.constant dense<0.000000e+00> : vector<8x128xf32>
    %291 = tpu.matmul %290, %3, %cst_65 {dimension_numbers = #tpu.dot_dimension_numbers<[1], [0], [0], [1], [0, 0, 1, 1], [], []>} : vector<8x32xf32>, vector<32x128xf32>, vector<8x128xf32> -> vector<8x128xf32>
    %cst_66 = arith.constant dense<0.000000e+00> : vector<8x128xf32>
    %292 = tpu.matmul %268, %4, %cst_66 {dimension_numbers = #tpu.dot_dimension_numbers<[1], [0], [0], [1], [0, 0, 1, 1], [], []>} : vector<8x32xf32>, vector<32x128xf32>, vector<8x128xf32> -> vector<8x128xf32>
    %293 = arith.addf %291, %292 : vector<8x128xf32>
    %294 = arith.addf %293, %7 : vector<8x128xf32>
    %295 = vector.extract_strided_slice %294 {offsets = [0, 0], sizes = [8, 96], strides = [1, 1]} : vector<8x128xf32> to vector<8x96xf32>
    %296 = arith.negf %295 : vector<8x96xf32>
    %297 = math.exp %296 : vector<8x96xf32>
    %cst_67 = arith.constant 1.000000e+00 : f32
    %298 = vector.broadcast %cst_67 : f32 to vector<8x96xf32>
    %299 = arith.addf %298, %297 : vector<8x96xf32>
    %300 = arith.divf %298, %299 : vector<8x96xf32>
    %301 = vector.extract_strided_slice %300 {offsets = [0, 0], sizes = [8, 32], strides = [1, 1]} : vector<8x96xf32> to vector<8x32xf32>
    %302 = vector.extract_strided_slice %300 {offsets = [0, 32], sizes = [8, 32], strides = [1, 1]} : vector<8x96xf32> to vector<8x32xf32>
    %303 = vector.extract_strided_slice %300 {offsets = [0, 64], sizes = [8, 32], strides = [1, 1]} : vector<8x96xf32> to vector<8x32xf32>
    %304 = vector.extract_strided_slice %294 {offsets = [0, 96], sizes = [8, 32], strides = [1, 1]} : vector<8x128xf32> to vector<8x32xf32>
    %305 = math.tanh %304 : vector<8x32xf32>
    %306 = arith.mulf %302, %266 : vector<8x32xf32>
    %307 = arith.mulf %301, %305 : vector<8x32xf32>
    %308 = arith.addf %306, %307 : vector<8x32xf32>
    %309 = math.tanh %308 : vector<8x32xf32>
    %310 = arith.mulf %303, %309 : vector<8x32xf32>
    %c6 = arith.constant 6 : index
    %c0_68 = arith.constant 0 : index
    %c0_69 = arith.constant 0 : index
    %311 = vector.load %arg3[%c6, %c0_68, %c0_69] : memref<12x8x32xf32, #tpu.memory_space<vmem>>, vector<1x8x32xf32>
    %312 = vector.shape_cast %311 : vector<1x8x32xf32> to vector<8x32xf32>
    %313 = vector.shape_cast %310 : vector<8x32xf32> to vector<1x8x32xf32>
    tpu.vector_store %arg3[%c6, %c0_68, %c0_69], %313 {strides = array<i32>} : memref<12x8x32xf32, #tpu.memory_space<vmem>>, vector<1x8x32xf32>,
    %314 = vector.extract_strided_slice %11 {offsets = [56, 0], sizes = [8, 128], strides = [1, 1]} : vector<64x128xf32> to vector<8x128xf32>
    %cst_70 = arith.constant dense<0.000000e+00> : vector<8x128xf32>
    %315 = tpu.matmul %290, %1, %cst_70 {dimension_numbers = #tpu.dot_dimension_numbers<[1], [0], [0], [1], [0, 0, 1, 1], [], []>} : vector<8x32xf32>, vector<32x128xf32>, vector<8x128xf32> -> vector<8x128xf32>
    %316 = arith.addf %314, %315 : vector<8x128xf32>
    %317 = vector.extract_strided_slice %316 {offsets = [0, 0], sizes = [8, 96], strides = [1, 1]} : vector<8x128xf32> to vector<8x96xf32>
    %318 = arith.negf %317 : vector<8x96xf32>
    %319 = math.exp %318 : vector<8x96xf32>
    %cst_71 = arith.constant 1.000000e+00 : f32
    %320 = vector.broadcast %cst_71 : f32 to vector<8x96xf32>
    %321 = arith.addf %320, %319 : vector<8x96xf32>
    %322 = arith.divf %320, %321 : vector<8x96xf32>
    %323 = vector.extract_strided_slice %322 {offsets = [0, 0], sizes = [8, 32], strides = [1, 1]} : vector<8x96xf32> to vector<8x32xf32>
    %324 = vector.extract_strided_slice %322 {offsets = [0, 32], sizes = [8, 32], strides = [1, 1]} : vector<8x96xf32> to vector<8x32xf32>
    %325 = vector.extract_strided_slice %322 {offsets = [0, 64], sizes = [8, 32], strides = [1, 1]} : vector<8x96xf32> to vector<8x32xf32>
    %326 = vector.extract_strided_slice %316 {offsets = [0, 96], sizes = [8, 32], strides = [1, 1]} : vector<8x128xf32> to vector<8x32xf32>
    %327 = math.tanh %326 : vector<8x32xf32>
    %328 = arith.mulf %324, %288 : vector<8x32xf32>
    %329 = arith.mulf %323, %327 : vector<8x32xf32>
    %330 = arith.addf %328, %329 : vector<8x32xf32>
    %331 = math.tanh %330 : vector<8x32xf32>
    %332 = arith.mulf %325, %331 : vector<8x32xf32>
    %cst_72 = arith.constant dense<0.000000e+00> : vector<8x128xf32>
    %333 = tpu.matmul %332, %3, %cst_72 {dimension_numbers = #tpu.dot_dimension_numbers<[1], [0], [0], [1], [0, 0, 1, 1], [], []>} : vector<8x32xf32>, vector<32x128xf32>, vector<8x128xf32> -> vector<8x128xf32>
    %cst_73 = arith.constant dense<0.000000e+00> : vector<8x128xf32>
    %334 = tpu.matmul %310, %4, %cst_73 {dimension_numbers = #tpu.dot_dimension_numbers<[1], [0], [0], [1], [0, 0, 1, 1], [], []>} : vector<8x32xf32>, vector<32x128xf32>, vector<8x128xf32> -> vector<8x128xf32>
    %335 = arith.addf %333, %334 : vector<8x128xf32>
    %336 = arith.addf %335, %7 : vector<8x128xf32>
    %337 = vector.extract_strided_slice %336 {offsets = [0, 0], sizes = [8, 96], strides = [1, 1]} : vector<8x128xf32> to vector<8x96xf32>
    %338 = arith.negf %337 : vector<8x96xf32>
    %339 = math.exp %338 : vector<8x96xf32>
    %cst_74 = arith.constant 1.000000e+00 : f32
    %340 = vector.broadcast %cst_74 : f32 to vector<8x96xf32>
    %341 = arith.addf %340, %339 : vector<8x96xf32>
    %342 = arith.divf %340, %341 : vector<8x96xf32>
    %343 = vector.extract_strided_slice %342 {offsets = [0, 0], sizes = [8, 32], strides = [1, 1]} : vector<8x96xf32> to vector<8x32xf32>
    %344 = vector.extract_strided_slice %342 {offsets = [0, 32], sizes = [8, 32], strides = [1, 1]} : vector<8x96xf32> to vector<8x32xf32>
    %345 = vector.extract_strided_slice %342 {offsets = [0, 64], sizes = [8, 32], strides = [1, 1]} : vector<8x96xf32> to vector<8x32xf32>
    %346 = vector.extract_strided_slice %336 {offsets = [0, 96], sizes = [8, 32], strides = [1, 1]} : vector<8x128xf32> to vector<8x32xf32>
    %347 = math.tanh %346 : vector<8x32xf32>
    %348 = arith.mulf %344, %308 : vector<8x32xf32>
    %349 = arith.mulf %343, %347 : vector<8x32xf32>
    %350 = arith.addf %348, %349 : vector<8x32xf32>
    %351 = math.tanh %350 : vector<8x32xf32>
    %352 = arith.mulf %345, %351 : vector<8x32xf32>
    %c7 = arith.constant 7 : index
    %c0_75 = arith.constant 0 : index
    %c0_76 = arith.constant 0 : index
    %353 = vector.load %arg3[%c7, %c0_75, %c0_76] : memref<12x8x32xf32, #tpu.memory_space<vmem>>, vector<1x8x32xf32>
    %354 = vector.shape_cast %353 : vector<1x8x32xf32> to vector<8x32xf32>
    %355 = vector.shape_cast %352 : vector<8x32xf32> to vector<1x8x32xf32>
    tpu.vector_store %arg3[%c7, %c0_75, %c0_76], %355 {strides = array<i32>} : memref<12x8x32xf32, #tpu.memory_space<vmem>>, vector<1x8x32xf32>,
    %c8 = arith.constant 8 : index
    %c0_77 = arith.constant 0 : index
    %c0_78 = arith.constant 0 : index
    %356 = vector.load %arg3[%c8, %c0_77, %c0_78] : memref<12x8x32xf32, #tpu.memory_space<vmem>>, vector<1x8x32xf32>
    %357 = vector.shape_cast %356 : vector<1x8x32xf32> to vector<8x32xf32>
    %358 = vector.shape_cast %332 : vector<8x32xf32> to vector<1x8x32xf32>
    tpu.vector_store %arg3[%c8, %c0_77, %c0_78], %358 {strides = array<i32>} : memref<12x8x32xf32, #tpu.memory_space<vmem>>, vector<1x8x32xf32>,
    %c10 = arith.constant 10 : index
    %c0_79 = arith.constant 0 : index
    %c0_80 = arith.constant 0 : index
    %359 = vector.load %arg3[%c10, %c0_79, %c0_80] : memref<12x8x32xf32, #tpu.memory_space<vmem>>, vector<1x8x32xf32>
    %360 = vector.shape_cast %359 : vector<1x8x32xf32> to vector<8x32xf32>
    %361 = vector.shape_cast %330 : vector<8x32xf32> to vector<1x8x32xf32>
    tpu.vector_store %arg3[%c10, %c0_79, %c0_80], %361 {strides = array<i32>} : memref<12x8x32xf32, #tpu.memory_space<vmem>>, vector<1x8x32xf32>,
    %c9 = arith.constant 9 : index
    %c0_81 = arith.constant 0 : index
    %c0_82 = arith.constant 0 : index
    %362 = vector.load %arg3[%c9, %c0_81, %c0_82] : memref<12x8x32xf32, #tpu.memory_space<vmem>>, vector<1x8x32xf32>
    %363 = vector.shape_cast %362 : vector<1x8x32xf32> to vector<8x32xf32>
    %364 = vector.shape_cast %352 : vector<8x32xf32> to vector<1x8x32xf32>
    tpu.vector_store %arg3[%c9, %c0_81, %c0_82], %364 {strides = array<i32>} : memref<12x8x32xf32, #tpu.memory_space<vmem>>, vector<1x8x32xf32>,
    %c11 = arith.constant 11 : index
    %c0_83 = arith.constant 0 : index
    %c0_84 = arith.constant 0 : index
    %365 = vector.load %arg3[%c11, %c0_83, %c0_84] : memref<12x8x32xf32, #tpu.memory_space<vmem>>, vector<1x8x32xf32>
    %366 = vector.shape_cast %365 : vector<1x8x32xf32> to vector<8x32xf32>
    %367 = vector.shape_cast %350 : vector<8x32xf32> to vector<1x8x32xf32>
    tpu.vector_store %arg3[%c11, %c0_83, %c0_84], %367 {strides = array<i32>} : memref<12x8x32xf32, #tpu.memory_space<vmem>>, vector<1x8x32xf32>,
    return
  }
}

</mosaic_0001>

<bundles_post_ra>
// kernel: tpu_custom_call.1
= control target key start
LH: loop header
LB: loop body
LE: loop exit
PB: predicated region body
PF: predicated region fallthrough
CT: control target
= control target key end

     0   :  { %8 = vsyncpa [#allocation3], 0  ;;  %s3637_s0 = inlined_call_operand.vmem [shape: f32[64,32], index: 0, kind: input, shape index: {}]   ;;  %s3638_s1 = inlined_call_operand.vmem [shape: f32[4,8,32], index: 1, kind: input, shape index: {}]   ;;  %s3639_s2 = inlined_call_operand.hbm [shape: f32[144,128], index: 2, kind: input, shape index: {}]   ;;  %s3640_s3 = inlined_call_operand.hbm [shape: f32[12,8,32], index: 3, kind: output, shape index: {}]  }
   0x1   :  { %9 = vsyncpa [#allocation4], 0  ;;  %s3093_s12 = smov [#allocation2]  }
   0x2   :  { %s19_s13 = sshll.u32 %s3093_s12, 4  ;;  %s20_s13 = int_to_ptr.vmem [resolvable:$true] %s19_s13 }
   0x3   :  { %s3057_s14 = scalar_lea.vmem %s20_s13, 2304  ;;  %p3062_p1 = scmp.lt.s32.totalorder %s20_s13, %s20_s13 }
   0x4   :  { %p3058_p0 = scmp.ne.s32.totalorder %s20_s13, %s3057_s14  ;;  %p3063_p2 = scmp.lt.s32.totalorder %s3057_s14, %s3057_s14 }
   0x6   :  { %p3064_p3 = por %p3063_p2, %p3062_p1 }
   0x8   :  { %p3065_p4 = pnand %p3064_p3, %p3058_p0 }
   0xa   :  { %3068 = shalt.err (!%p3065_p4)
}
   0xb   :  { %s3094_s15 = smov 128   ;;  %s3095_s16 = smov 8  }
   0xc   :  { %25 = dma.hbm_to_vmem [thread:$0]  %s3639_s2, 2304, %s20_s13, [#allocation3], %s3094_s15, %s3094_s15, %s3095_s16  }
   0xd   :  { %3089 = dma.done.wait [#allocation3], 2304  }
   0xe   :  { %3090 = vsyncadd [#allocation3], 4294964992  ;;  %v3096_v0 = vmov 0.0   ;;  %vm3097_vm0 = vmmov 0   ;;  %v32_v1 = vld [vmem:[#allocation2 + $0x18] sm:$0xff]  ;;  %v31_v2 = vld [vmem:[#allocation2 + $0x10] sm:$0xff] }
   0xf   :  { %2634 = vmatprep.subr.mxu1 %v3096_v0  ;;  %2642 = vmatprep.mubr.msk.f32.mxu1 %vm3097_vm0, %v3096_v0  ;;  %v3131_v3 = vld [vmem:[#allocation2 + $0x38] sm:$0xff]  ;;  %v3134_v4 = vld [vmem:[#allocation2 + $0x30] sm:$0xff]  ;;  %v30_v5 = vld [vmem:[#allocation2 + $0x8] sm:$0xff]  ;;  %vm63_vm1 = vcmask 261120   ;;  %s3098_s24 = smov 32   ;;  %s3101_s18 = smov [#allocation5]  }
  0x10   :  { %2614 = vmatprep.subr.mxu0 %v32_v1  ;;  %2635 = vmatpush3.msra.mxu1 %v3131_v3  ;;  %v51_v6 = vld [vmem:[%s3637_s0] sm:$0xff]  ;;  %v3141_v7 = vld [vmem:[#allocation2 + $0x28] sm:$0xff]  ;;  %v2440_v20 = vld [vmem:[%s3638_s1 + $0x10] sm:$0xff]  ;;  %s2417_s2 = sshll.u32 %s3101_s18, 4  ;;  %s2418_s2 = int_to_ptr.vmem [resolvable:$true] %s2417_s2 }
  0x11   :  { %2615 = vmatpush3.msra.mxu0 %v32_v1  ;;  %2636 = vmatprep.subr.mxu1 %v3096_v0  ;;  %v29_v8 = vld [vmem:[#allocation2] sm:$0xff]  ;;  %v52_v10 = vld [vmem:[%s3637_s0 + $0x8] sm:$0xff]  ;;  %v53_v32 = vld [vmem:[%s3637_s0 + $0x10] sm:$0xff]  ;;  %s3069_s19 = scalar_lea.vmem %s2418_s2, 1536  ;;  %p3074_p6 = scmp.lt.s32.totalorder %s2418_s2, %s2418_s2 }
  0x12   :  { %2616 = vmatprep.subr.mxu0 %v31_v2  ;;  %2637 = vmatpush3.msra.mxu1 %v3134_v4  ;;  %v3145_v9 = vld [vmem:[#allocation2 + $0x20] sm:$0xff]  ;;  %v54_v34 = vld [vmem:[%s3637_s0 + $0x18] sm:$0xff]  ;;  %v3199_v38 = vld [vmem:[#allocation2 + $0x70] sm:$0xff]  ;;  %p3070_p5 = scmp.ne.s32.totalorder %s2418_s2, %s3069_s19  ;;  %p3075_p7 = scmp.lt.s32.totalorder %s3069_s19, %s3069_s19 }
  0x13   :  { %2617 = vmatpush3.msra.mxu0 %v31_v2  ;;  %2638 = vmatprep.subr.mxu1 %v3096_v0  ;;  %v193_v11 = vld [vmem:[%s3638_s1] sm:$0xff]  ;;  %v3188_v35 = vld [vmem:[#allocation2 + $0x78] sm:$0xff]  ;;  %v56_v39 = vld [vmem:[%s3637_s0 + $0x28] sm:$0xff] }
  0x14   :  { %2618 = vmatprep.subr.mxu0 %v30_v5  ;;  %2622 = vmatprep.mubr.msk.f32.mxu0 %vm63_vm1, %v51_v6  ;;  %v3164_v14 = vld [vmem:[#allocation2 + $0x40] ss:$0 sm:$0xff]  ;;  %v3190_v36 = vld [vmem:[#allocation2 + $0x58] sm:$0xff]  ;;  %v3208_v40 = vld [vmem:[#allocation2 + $0x68] sm:$0xff]  ;;  %p3076_p8 = por %p3075_p7, %p3074_p6 }
  0x15   :  { %2619 = vmatpush3.msra.mxu0 %v30_v5  ;;  %2639 = vmatpush3.msra.mxu1 %v3141_v7  ;;  %v3176_v31 = vld [vmem:[#allocation2 + $0x60] sm:$0xff]  ;;  %v3210_v41 = vld [vmem:[#allocation2 + $0x50] sm:$0xff]  ;;  %v2439_v43 = vld [vmem:[%s3638_s1 + $0x8] sm:$0xff] }
  0x16   :  { %2620 = vmatprep.subr.mxu0 %v29_v8  ;;  %2640 = vmatprep.subr.mxu1 %v3096_v0  ;;  %v3181_v33 = vld [vmem:[#allocation2 + $0x80] sm:$0xff]  ;;  %v57_v42 = vld [vmem:[%s3637_s0 + $0x30] sm:$0xff]  ;;  %v58_v44 = vld [vmem:[%s3637_s0 + $0x38] sm:$0xff]  ;;  %p3077_p9 = pnand %p3076_p8, %p3070_p5 }
  0x17   :  { %2621 = vmatpush3.msra.mxu0 %v29_v8  ;;  %2641 = vmatpush3.msra.mxu1 %v3145_v9  ;;  %v55_v37 = vld [vmem:[%s3637_s0 + $0x20] sm:$0xff]  ;;  %v3231_v46 = vld [vmem:[#allocation2 + $0x48] sm:$0xff]  ;;  %s3099_s0 = smov 64  }
  0x18   :  { %2623 = vmatmul.mubr.msk.f32.vlgmr.msra.gmra.mxu0 %vm63_vm1, %v52_v10  ;;  %2643 = vmatmul.mubr.msk.f32.vlgmr.msra.gmra.mxu1 %vm63_vm1, %v193_v11  ;;  %v3286_v59 = vld [vmem:[#allocation2 + $0x88] ss:$0 sm:$0xff]  ;;  %v2441_v10 = vld [vmem:[%s3638_s1 + $0x18] sm:$0xff]  ;;  %s3100_s1 = smov 96  }
  0x19   :  { %2656 = vmatprep.subr.mxu0 %v3096_v0  ;;  %2645 = vmatprep.subr.mxu1 %v3096_v0 }
  0x1a   :  { %2653 = vmatprep.mubr.msk.f32.mxu1 %vm3097_vm0, %v3096_v0  ;;  %2657 = vmatpush3.msra.mxu0 %v3176_v31 }
  0x1b   :  { %2625 = vmatprep.mubr.msk.f32.mxu0 %vm63_vm1, %v53_v32  ;;  %2646 = vmatpush3.msra.mxu1 %v3181_v33 }
  0x1c   :  { %2626 = vmatmul.mubr.msk.f32.gmra.mxu0 %vm63_vm1, %v54_v34  ;;  %2647 = vmatprep.subr.mxu1 %v3096_v0 }
  0x1d   :  { %2658 = vmatprep.subr.mxu0 %v3096_v0  ;;  %2648 = vmatpush3.msra.mxu1 %v3188_v35 }
  0x1e   :  { %2659 = vmatpush3.msra.mxu0 %v3190_v36  ;;  %2649 = vmatprep.subr.mxu1 %v3096_v0 }
  0x1f   :  { %2628 = vmatprep.mubr.msk.f32.mxu0 %vm63_vm1, %v55_v37  ;;  %2650 = vmatpush3.msra.mxu1 %v3199_v38 }
  0x20   :  { %2629 = vmatmul.mubr.msk.f32.gmra.mxu0 %vm63_vm1, %v56_v39  ;;  %2651 = vmatprep.subr.mxu1 %v3096_v0 }
  0x21   :  { %2660 = vmatprep.subr.mxu0 %v3096_v0  ;;  %2652 = vmatpush3.msra.mxu1 %v3208_v40 }
  0x22   :  { %2661 = vmatpush3.msra.mxu0 %v3210_v41  ;;  %2667 = vmatprep.subr.mxu1 %v3096_v0 }
  0x23   :  { %2631 = vmatprep.mubr.msk.f32.mxu0 %vm63_vm1, %v57_v42  ;;  %2654 = vmatmul.mubr.msk.f32.vlgmr.msra.gmra.mxu1 %vm63_vm1, %v2439_v43 }
  0x24   :  { %2632 = vmatmul.mubr.msk.f32.gmra.mxu0 %vm63_vm1, %v58_v44  ;;  %2668 = vmatpush3.msra.mxu1 %v3131_v3 }
  0x25   :  { %2669 = vmatprep.subr.mxu1 %v3096_v0  ;;  %2662 = vmatprep.subr.mxu0 %v3096_v0 }
  0x26   :  { %2670 = vmatpush3.msra.mxu1 %v3134_v4  ;;  %2663 = vmatpush3.msra.mxu0 %v3231_v46 }
  0x27   :  { %2671 = vmatprep.subr.mxu1 %v3096_v0  ;;  %2664 = vmatprep.mubr.msk.f32.mxu0 %vm3097_vm0, %v3096_v0 }
  0x28   :  { %2672 = vmatpush3.msra.mxu1 %v3141_v7  ;;  %2675 = vmatprep.mubr.msk.f32.mxu1 %vm3097_vm0, %v3096_v0 }
  0x29   :  { %2673 = vmatprep.subr.mxu1 %v3096_v0  ;;  %2678 = vmatprep.subr.mxu0 %v3096_v0 }
  0x2a   :  { %2674 = vmatpush3.msra.mxu1 %v3145_v9 }
  0x2b   :  { %2689 = vmatprep.subr.mxu1 %v3096_v0 }
  0xd8   :  { %v3162_v12 = vpop.f32.mrf.mxu0  ;;  %v269_v13 = vpop.f32.mrf.mxu1 }
  0xd9   :  { %v160_v58 = vadd.f32 %v3162_v12, %v3164_v14 }
  0xda   :  { %v154_v15 = vpop.f32.mrf.mxu0  ;;  %v2644_v16 = vpop.f32.mrf.mxu1 }
  0xdb   :  { %v155_v17 = vadd.f32 %v3164_v14, %v154_v15 }
  0xdc   :  { %v3272_v52 = vpop.f32.mrf.mxu0 }
  0xdd   :  { %v273_v18 = vadd.f32 %v269_v13, %v155_v17 }
  0xde   :  { %v3274_v53 = vpop.f32.mrf.mxu0 }
  0xdf   :  { %2907 = vtanh.f32 %v273_v18  ;;  %v2443_v21 = vmul.f32 -1.442695, %v273_v18 }
  0xe0   :  { %v3276_v54 = vpop.f32.mrf.mxu0 }
  0xe1   :  { %2909 = vpow2.f32 %v2443_v21 }
  0xe2   :  { %v3278_v55 = vpop.f32.mrf.mxu0 }
  0xe3   :  { %v371_v49 = vpop.f32.mrf.mxu1 }
  0xe4   :  { %v3280_v56 = vpop.f32.mrf.mxu0 }
  0xe5   :  { %v2655_v50 = vpop.f32.mrf.mxu1 }
  0xe6   :  { %v3282_v57 = vpop.f32.mrf.mxu0 }
  0xec   :  { %v2908_v19 = vpop.eup %2907 }
  0xed   :  { %287 = vrot.lane.b32.xlu0 %v2908_v19, %s3098_s24 }
  0xee   :  { %v2910_v22 = vpop.eup %2909 }
  0xef   :  { %v277_v23 = vadd.f32 1.0, %v2910_v22 }
  0xf1   :  { %282 = vrot.lane.b32.xlu0 %v2440_v20, %s3098_s24  ;;  %2911 = vrcp.f32 %v277_v23 }
  0xfe   :  { %v2912_v24 = vpop.eup %2911 }
 0x15f   :  { %v288_v25 = vpop.permute.xlu0 %287 }
 0x160   :  { %v290_v26 = vmul.f32 %v2912_v24, %v288_v25 }
 0x162   :  { %292 = vrot.lane.b32.xlu1 %v290_v26, %s3098_s24 }
 0x163   :  { %v283_v27 = vpop.permute.xlu0 %282 }
 0x164   :  { %v285_v28 = vmul.f32 %v2912_v24, %v283_v27 }
 0x1d4   :  { %v293_v29 = vpop.permute.xlu1 %292 }
 0x1d5   :  { %v3173_v30 = vadd.f32 %v293_v29, %v285_v28 }
 0x1d7   :  { %2913 = vtanh.f32 %v3173_v30 }
 0x1e4   :  { %v2914_v45 = vpop.eup %2913 }
 0x1e5   :  { %298 = vrot.lane.b32.xlu1 %v2914_v45, %s3098_s24 }
 0x257   :  { %v299_v47 = vpop.permute.xlu1 %298 }
 0x258   :  { %v301_v48 = vmul.f32 %v2912_v24, %v299_v47 }
 0x25a   :  { %376 = vrot.lane.b32.xlu0 %v301_v48, %s3099_s0 }
 0x2cc   :  { %v377_v51 = vpop.permute.xlu0 %376 }
 0x2cd   :  { %2665 = vmatmul.mubr.msk.f32.vlgmr.msra.gmra.mxu0 %vm63_vm1, %v377_v51  ;;  %2676 = vmatmul.mubr.msk.f32.vlgmr.msra.gmra.mxu1 %vm63_vm1, %v377_v51 }
 0x2ce   :  { %2690 = vmatpush3.msra.mxu1 %v3176_v31  ;;  %2679 = vmatpush3.msra.mxu0 %v3181_v33 }
 0x2cf   :  { %2691 = vmatprep.subr.mxu1 %v3096_v0  ;;  %2680 = vmatprep.subr.mxu0 %v3096_v0 }
 0x2d0   :  { %2692 = vmatpush3.msra.mxu1 %v3190_v36  ;;  %2681 = vmatpush3.msra.mxu0 %v3188_v35 }
 0x2d1   :  { %2693 = vmatprep.subr.mxu1 %v3096_v0  ;;  %2682 = vmatprep.subr.mxu0 %v3096_v0 }
 0x2d2   :  { %2694 = vmatpush3.msra.mxu1 %v3210_v41  ;;  %2683 = vmatpush3.msra.mxu0 %v3199_v38 }
 0x2d3   :  { %2695 = vmatprep.subr.mxu1 %v3096_v0  ;;  %2684 = vmatprep.subr.mxu0 %v3096_v0 }
 0x2d4   :  { %2696 = vmatpush3.msra.mxu1 %v3231_v46  ;;  %2697 = vmatprep.mubr.msk.f32.mxu1 %vm3097_vm0, %v3096_v0 }
 0x2d5   :  { %2685 = vmatpush3.msra.mxu0 %v3208_v40  ;;  %2686 = vmatprep.mubr.msk.f32.mxu0 %vm3097_vm0, %v3096_v0 }
 0x2d6   :  { %2700 = vmatprep.subr.mxu0 %v3096_v0  ;;  %2711 = vmatprep.subr.mxu1 %v3096_v0 }
 0x38d   :  { %v446_v60 = vpop.f32.mrf.mxu0  ;;  %v550_v61 = vpop.f32.mrf.mxu1 }
 0x38e   :  { %v447_v62 = vadd.f32 %v446_v60, %v371_v49  ;;  %v554_v63 = vadd.f32 %v550_v61, %v160_v58  ;;  %v165_v60 = vadd.f32 %v3164_v14, %v3274_v53 }
 0x38f   :  { %v2666_v1 = vpop.f32.mrf.mxu0  ;;  %v2677_v2 = vpop.f32.mrf.mxu1 }
 0x390   :  { %v450_v5 = vadd.f32 %v3286_v59, %v447_v62  ;;  %2915 = vtanh.f32 %v554_v63  ;;  %v2448_v11 = vmul.f32 -1.442695, %v554_v63 }
 0x392   :  { %2917 = vtanh.f32 %v450_v5  ;;  %v2446_v12 = vmul.f32 -1.442695, %v450_v5 }
 0x393   :  { %2919 = vpow2.f32 %v2448_v11 }
 0x394   :  { %2921 = vpow2.f32 %v2446_v12 }
 0x39d   :  { %v2916_v6 = vpop.eup %2915 }
 0x39e   :  { %564 = vrot.lane.b32.xlu0 %v2916_v6, %s3098_s24 }
 0x39f   :  { %v2918_v8 = vpop.eup %2917 }
 0x3a0   :  { %464 = vrot.lane.b32.xlu1 %v2918_v8, %s3098_s24  ;;  %v2920_v13 = vpop.eup %2919 }
 0x3a1   :  { %v2922_v15 = vpop.eup %2921  ;;  %v558_v16 = vadd.f32 1.0, %v2920_v13 }
 0x3a2   :  { %v454_v17 = vadd.f32 1.0, %v2922_v15 }
 0x3a3   :  { %2923 = vrcp.f32 %v558_v16 }
 0x3a4   :  { %459 = vrot.lane.b32.xlu1 %v2441_v10, %s3098_s24  ;;  %2925 = vrcp.f32 %v454_v17 }
 0x3b0   :  { %v2924_v18 = vpop.eup %2923 }
 0x3b1   :  { %v2926_v21 = vpop.eup %2925  ;;  %v562_v25 = vmul.f32 %v2924_v18, %v3173_v30 }
 0x410   :  { %v565_v19 = vpop.permute.xlu0 %564 }
 0x411   :  { %v567_v20 = vmul.f32 %v2924_v18, %v565_v19 }
 0x412   :  { %v465_v22 = vpop.permute.xlu1 %464 }
 0x413   :  { %v467_v23 = vmul.f32 %v2926_v21, %v465_v22  ;;  %569 = vrot.lane.b32.xlu1 %v567_v20, %s3098_s24 }
 0x415   :  { %469 = vrot.lane.b32.xlu0 %v467_v23, %s3098_s24 }
 0x416   :  { %v460_v24 = vpop.permute.xlu1 %459 }
 0x417   :  { %v462_v27 = vmul.f32 %v2926_v21, %v460_v24 }
 0x485   :  { %v570_v26 = vpop.permute.xlu1 %569 }
 0x486   :  { %v3298_v28 = vadd.f32 %v570_v26, %v562_v25 }
 0x487   :  { %v470_v29 = vpop.permute.xlu0 %469 }
 0x488   :  { %2927 = vtanh.f32 %v3298_v28  ;;  %v3301_v32 = vadd.f32 %v470_v29, %v462_v27 }
 0x48a   :  { %2929 = vtanh.f32 %v3301_v32 }
 0x495   :  { %v2928_v34 = vpop.eup %2927 }
 0x496   :  { %575 = vrot.lane.b32.xlu1 %v2928_v34, %s3098_s24 }
 0x497   :  { %v2930_v37 = vpop.eup %2929 }
 0x498   :  { %475 = vrot.lane.b32.xlu0 %v2930_v37, %s3098_s24 }
 0x508   :  { %v576_v39 = vpop.permute.xlu1 %575 }
 0x509   :  { %v578_v42 = vmul.f32 %v2924_v18, %v576_v39 }
 0x50a   :  { %v476_v30 = vpop.permute.xlu0 %475 }
 0x50b   :  { %v478_v43 = vmul.f32 %v2926_v21, %v476_v30  ;;  %652 = vrot.lane.b32.xlu1 %v578_v42, %s3099_s0 }
 0x50d   :  { %480 = vrot.lane.b32.xlu0 %v478_v43, %s3099_s0  ;;  %v170_v43 = vadd.f32 %v3272_v52, %v3164_v14 }
 0x57d   :  { %v653_v44 = vpop.permute.xlu1 %652 }
 0x57e   :  { %2698 = vmatmul.mubr.msk.f32.vlgmr.msra.gmra.mxu1 %vm63_vm1, %v653_v44 }
 0x57f   :  { %v481_v45 = vpop.permute.xlu0 %480  ;;  %2712 = vmatpush3.msra.mxu1 %v3181_v33  ;;  %2719 = vmatprep.mubr.msk.f32.mxu1 %vm3097_vm0, %v3096_v0 }
 0x580   :  { %483 = vst.msk [vmem:[#allocation5] sm:$0xff] %vm63_vm1, %v481_v45  ;;  %2687 = vmatmul.mubr.msk.f32.vlgmr.msra.gmra.mxu0 %vm63_vm1, %v481_v45  ;;  %2713 = vmatprep.subr.mxu1 %v3096_v0 }
 0x581   :  { %2701 = vmatpush3.msra.mxu0 %v3131_v3  ;;  %2708 = vmatprep.mubr.msk.f32.mxu0 %vm3097_vm0, %v3096_v0 }
 0x582   :  { %2702 = vmatprep.subr.mxu0 %v3096_v0  ;;  %2714 = vmatpush3.msra.mxu1 %v3188_v35 }
 0x583   :  { %2703 = vmatpush3.msra.mxu0 %v3134_v4  ;;  %2715 = vmatprep.subr.mxu1 %v3096_v0 }
 0x584   :  { %2704 = vmatprep.subr.mxu0 %v3096_v0  ;;  %2716 = vmatpush3.msra.mxu1 %v3199_v38 }
 0x585   :  { %2705 = vmatpush3.msra.mxu0 %v3141_v7  ;;  %2717 = vmatprep.subr.mxu1 %v3096_v0 }
 0x586   :  { %2706 = vmatprep.subr.mxu0 %v3096_v0  ;;  %2718 = vmatpush3.msra.mxu1 %v3208_v40 }
 0x587   :  { %2707 = vmatpush3.msra.mxu0 %v3145_v9  ;;  %2733 = vmatprep.subr.mxu1 %v3096_v0 }
 0x588   :  { %2709 = vmatmul.mubr.msk.f32.vlgmr.msra.gmra.mxu0 %vm63_vm1, %v653_v44  ;;  %2722 = vmatprep.subr.mxu0 %v3096_v0 }
 0x589   :  { %2723 = vmatpush3.msra.mxu0 %v3176_v31  ;;  %2730 = vmatprep.mubr.msk.f32.mxu0 %vm3097_vm0, %v3096_v0 }
 0x58a   :  { %2724 = vmatprep.subr.mxu0 %v3096_v0 }
 0x58b   :  { %2725 = vmatpush3.msra.mxu0 %v3190_v36 }
 0x58c   :  { %2726 = vmatprep.subr.mxu0 %v3096_v0 }
 0x58d   :  { %2727 = vmatpush3.msra.mxu0 %v3210_v41 }
 0x58e   :  { %2728 = vmatprep.subr.mxu0 %v3096_v0 }
 0x58f   :  { %2729 = vmatpush3.msra.mxu0 %v3231_v46 }
 0x590   :  { %2744 = vmatprep.subr.mxu0 %v3096_v0 }
 0x63e   :  { %v722_v47 = vpop.f32.mrf.mxu1 }
 0x640   :  { %v647_v48 = vpop.f32.mrf.mxu0  ;;  %v2699_v49 = vpop.f32.mrf.mxu1 }
 0x641   :  { %v723_v50 = vadd.f32 %v722_v47, %v647_v48 }
 0x642   :  { %v2688_v51 = vpop.f32.mrf.mxu0 }
 0x643   :  { %v726_v58 = vadd.f32 %v3286_v59, %v723_v50 }
 0x645   :  { %2931 = vtanh.f32 %v726_v58  ;;  %v2451_v5 = vmul.f32 -1.442695, %v726_v58 }
 0x648   :  { %v823_v61 = vpop.f32.mrf.mxu0 }
 0x649   :  { %v827_v62 = vadd.f32 %v823_v61, %v165_v60 }
 0x64a   :  { %v2710_v63 = vpop.f32.mrf.mxu0 }
 0x64b   :  { %2933 = vtanh.f32 %v827_v62  ;;  %v2453_v6 = vmul.f32 -1.442695, %v827_v62 }
 0x64c   :  { %2935 = vpow2.f32 %v2451_v5 }
 0x64d   :  { %2937 = vpow2.f32 %v2453_v6 }
 0x652   :  { %v2932_v1 = vpop.eup %2931 }
 0x653   :  { %736 = vrot.lane.b32.xlu0 %v2932_v1, %s3098_s24 }
 0x658   :  { %v2934_v2 = vpop.eup %2933 }
 0x659   :  { %837 = vrot.lane.b32.xlu1 %v2934_v2, %s3098_s24  ;;  %v2936_v8 = vpop.eup %2935 }
 0x65a   :  { %v730_v10 = vadd.f32 1.0, %v2936_v8  ;;  %v2938_v11 = vpop.eup %2937 }
 0x65b   :  { %v831_v12 = vadd.f32 1.0, %v2938_v11 }
 0x65c   :  { %2939 = vrcp.f32 %v730_v10 }
 0x65d   :  { %2941 = vrcp.f32 %v831_v12 }
 0x669   :  { %v2940_v53 = vpop.eup %2939 }
 0x66a   :  { %v2942_v16 = vpop.eup %2941  ;;  %v734_v19 = vmul.f32 %v2940_v53, %v3301_v32 }
 0x66b   :  { %v835_v22 = vmul.f32 %v2942_v16, %v3298_v28 }
 0x6c5   :  { %v737_v13 = vpop.permute.xlu0 %736 }
 0x6c6   :  { %v739_v15 = vmul.f32 %v2940_v53, %v737_v13 }
 0x6c8   :  { %741 = vrot.lane.b32.xlu0 %v739_v15, %s3098_s24 }
 0x6cb   :  { %v838_v17 = vpop.permute.xlu1 %837 }
 0x6cc   :  { %v840_v18 = vmul.f32 %v2942_v16, %v838_v17 }
 0x6ce   :  { %842 = vrot.lane.b32.xlu1 %v840_v18, %s3098_s24 }
 0x73a   :  { %v742_v20 = vpop.permute.xlu0 %741 }
 0x73b   :  { %v3350_v21 = vadd.f32 %v742_v20, %v734_v19 }
 0x73d   :  { %2943 = vtanh.f32 %v3350_v21 }
 0x740   :  { %v843_v23 = vpop.permute.xlu1 %842 }
 0x741   :  { %v3354_v24 = vadd.f32 %v843_v23, %v835_v22 }
 0x743   :  { %2945 = vtanh.f32 %v3354_v24 }
 0x74a   :  { %v2944_v25 = vpop.eup %2943 }
 0x74b   :  { %747 = vrot.lane.b32.xlu0 %v2944_v25, %s3098_s24 }
 0x750   :  { %v2946_v26 = vpop.eup %2945 }
 0x751   :  { %848 = vrot.lane.b32.xlu1 %v2946_v26, %s3098_s24 }
 0x7bd   :  { %v748_v27 = vpop.permute.xlu0 %747 }
 0x7be   :  { %v750_v29 = vmul.f32 %v2940_v53, %v748_v27 }
 0x7c0   :  { %752 = vrot.lane.b32.xlu0 %v750_v29, %s3099_s0 }
 0x7c3   :  { %v849_v32 = vpop.permute.xlu1 %848 }
 0x7c4   :  { %v851_v34 = vmul.f32 %v2942_v16, %v849_v32 }
 0x7c6   :  { %925 = vrot.lane.b32.xlu1 %v851_v34, %s3099_s0 }
 0x832   :  { %v753_v28 = vpop.permute.xlu0 %752 }
 0x833   :  { %756 = vst.msk [vmem:[#allocation5 + $0x8] sm:$0xff] %vm63_vm1, %v753_v28  ;;  %2720 = vmatmul.mubr.msk.f32.vlgmr.msra.gmra.mxu1 %vm63_vm1, %v753_v28 }
 0x834   :  { %2734 = vmatpush3.msra.mxu1 %v3131_v3  ;;  %2741 = vmatprep.mubr.msk.f32.mxu1 %vm3097_vm0, %v3096_v0 }
 0x835   :  { %2735 = vmatprep.subr.mxu1 %v3096_v0 }
 0x836   :  { %2736 = vmatpush3.msra.mxu1 %v3134_v4 }
 0x837   :  { %2737 = vmatprep.subr.mxu1 %v3096_v0 }
 0x838   :  { %2738 = vmatpush3.msra.mxu1 %v3141_v7  ;;  %v926_v37 = vpop.permute.xlu1 %925 }
 0x839   :  { %2731 = vmatmul.mubr.msk.f32.vlgmr.msra.gmra.mxu0 %vm63_vm1, %v926_v37  ;;  %2739 = vmatprep.subr.mxu1 %v3096_v0 }
 0x83a   :  { %2740 = vmatpush3.msra.mxu1 %v3145_v9  ;;  %2745 = vmatpush3.msra.mxu0 %v3181_v33 }
 0x83b   :  { %2742 = vmatmul.mubr.msk.f32.vlgmr.msra.gmra.mxu1 %vm63_vm1, %v926_v37  ;;  %2755 = vmatprep.subr.mxu1 %v3096_v0  ;;  %v175_v37 = vadd.f32 %v3164_v14, %v3278_v55 }
 0x83c   :  { %2746 = vmatprep.subr.mxu0 %v3096_v0  ;;  %2756 = vmatpush3.msra.mxu1 %v3176_v31 }
 0x83d   :  { %2747 = vmatpush3.msra.mxu0 %v3188_v35  ;;  %2757 = vmatprep.subr.mxu1 %v3096_v0 }
 0x83e   :  { %2748 = vmatprep.subr.mxu0 %v3096_v0  ;;  %2758 = vmatpush3.msra.mxu1 %v3190_v36 }
 0x83f   :  { %2749 = vmatpush3.msra.mxu0 %v3199_v38  ;;  %2759 = vmatprep.subr.mxu1 %v3096_v0 }
 0x840   :  { %2750 = vmatprep.subr.mxu0 %v3096_v0  ;;  %2760 = vmatpush3.msra.mxu1 %v3210_v41 }
 0x841   :  { %2751 = vmatpush3.msra.mxu0 %v3208_v40  ;;  %2761 = vmatprep.subr.mxu1 %v3096_v0 }
 0x842   :  { %2762 = vmatpush3.msra.mxu1 %v3231_v46  ;;  %2763 = vmatprep.mubr.msk.f32.mxu1 %vm3097_vm0, %v3096_v0 }
 0x843   :  { %2752 = vmatprep.mubr.msk.f32.mxu0 %vm3097_vm0, %v3096_v0  ;;  %2766 = vmatprep.subr.mxu0 %v3096_v0 }
 0x844   :  { %2777 = vmatprep.subr.mxu1 %v3096_v0 }
 0x8f3   :  { %v920_v39 = vpop.f32.mrf.mxu1 }
 0x8f5   :  { %v2721_v42 = vpop.f32.mrf.mxu1 }
 0x8f9   :  { %v995_v30 = vpop.f32.mrf.mxu0 }
 0x8fa   :  { %v996_v44 = vadd.f32 %v995_v30, %v920_v39 }
 0x8fb   :  { %v2732_v45 = vpop.f32.mrf.mxu0  ;;  %v1096_v47 = vpop.f32.mrf.mxu1 }
 0x8fc   :  { %v999_v48 = vadd.f32 %v3286_v59, %v996_v44  ;;  %v1100_v49 = vadd.f32 %v1096_v47, %v170_v43 }
 0x8fd   :  { %v2743_v50 = vpop.f32.mrf.mxu1 }
 0x8fe   :  { %2947 = vtanh.f32 %v999_v48  ;;  %v2456_v60 = vmul.f32 -1.442695, %v999_v48  ;;  %v2458_v61 = vmul.f32 -1.442695, %v1100_v49 }
 0x8ff   :  { %2949 = vtanh.f32 %v1100_v49 }
 0x900   :  { %2951 = vpow2.f32 %v2456_v60 }
 0x901   :  { %2953 = vpow2.f32 %v2458_v61 }
 0x90b   :  { %v2948_v51 = vpop.eup %2947 }
 0x90c   :  { %v2950_v58 = vpop.eup %2949  ;;  %1009 = vrot.lane.b32.xlu0 %v2948_v51, %s3098_s24 }
 0x90d   :  { %1110 = vrot.lane.b32.xlu1 %v2950_v58, %s3098_s24  ;;  %v2952_v52 = vpop.eup %2951 }
 0x90e   :  { %v2954_v62 = vpop.eup %2953  ;;  %v1003_v63 = vadd.f32 1.0, %v2952_v52 }
 0x90f   :  { %v1104_v1 = vadd.f32 1.0, %v2954_v62 }
 0x910   :  { %2955 = vrcp.f32 %v1003_v63 }
 0x911   :  { %2957 = vrcp.f32 %v1104_v1 }
 0x91d   :  { %v2956_v2 = vpop.eup %2955 }
 0x91e   :  { %v2958_v6 = vpop.eup %2957  ;;  %v1007_v12 = vmul.f32 %v2956_v2, %v3350_v21 }
 0x91f   :  { %v1108_v53 = vmul.f32 %v2958_v6, %v3354_v24 }
 0x97e   :  { %v1010_v5 = vpop.permute.xlu0 %1009 }
 0x97f   :  { %v1111_v8 = vpop.permute.xlu1 %1110  ;;  %v1012_v10 = vmul.f32 %v2956_v2, %v1010_v5 }
 0x980   :  { %v1113_v11 = vmul.f32 %v2958_v6, %v1111_v8 }
 0x981   :  { %1014 = vrot.lane.b32.xlu0 %v1012_v10, %s3098_s24 }
 0x982   :  { %1115 = vrot.lane.b32.xlu1 %v1113_v11, %s3098_s24 }
 0x9f3   :  { %v1015_v13 = vpop.permute.xlu0 %1014 }
 0x9f4   :  { %v1116_v15 = vpop.permute.xlu1 %1115  ;;  %v3404_v16 = vadd.f32 %v1015_v13, %v1007_v12 }
 0x9f5   :  { %v3406_v17 = vadd.f32 %v1116_v15, %v1108_v53 }
 0x9f6   :  { %2959 = vtanh.f32 %v3404_v16 }
 0x9f7   :  { %2961 = vtanh.f32 %v3406_v17 }
 0xa03   :  { %v2960_v18 = vpop.eup %2959 }
 0xa04   :  { %v2962_v19 = vpop.eup %2961  ;;  %1020 = vrot.lane.b32.xlu0 %v2960_v18, %s3098_s24  ;;  %v180_v18 = vadd.f32 %v3276_v54, %v3164_v14 }
 0xa05   :  { %1121 = vrot.lane.b32.xlu1 %v2962_v19, %s3098_s24 }
 0xa76   :  { %v1021_v20 = vpop.permute.xlu0 %1020 }
 0xa77   :  { %v1122_v21 = vpop.permute.xlu1 %1121  ;;  %v1023_v22 = vmul.f32 %v2956_v2, %v1021_v20 }
 0xa78   :  { %v1124_v23 = vmul.f32 %v2958_v6, %v1122_v21 }
 0xa79   :  { %1025 = vrot.lane.b32.xlu0 %v1023_v22, %s3099_s0 }
 0xa7a   :  { %1198 = vrot.lane.b32.xlu1 %v1124_v23, %s3099_s0 }
 0xaeb   :  { %v1026_v24 = vpop.permute.xlu0 %1025 }
 0xaec   :  { %v1199_v25 = vpop.permute.xlu1 %1198  ;;  %1029 = vst.msk [vmem:[#allocation5 + $0x10] sm:$0xff] %vm63_vm1, %v1026_v24  ;;  %2753 = vmatmul.mubr.msk.f32.vlgmr.msra.gmra.mxu0 %vm63_vm1, %v1026_v24 }
 0xaed   :  { %2764 = vmatmul.mubr.msk.f32.vlgmr.msra.gmra.mxu1 %vm63_vm1, %v1199_v25  ;;  %2767 = vmatpush3.msra.mxu0 %v3131_v3 }
 0xaee   :  { %2768 = vmatprep.subr.mxu0 %v3096_v0  ;;  %2774 = vmatprep.mubr.msk.f32.mxu0 %vm3097_vm0, %v3096_v0 }
 0xaef   :  { %2769 = vmatpush3.msra.mxu0 %v3134_v4  ;;  %2778 = vmatpush3.msra.mxu1 %v3181_v33 }
 0xaf0   :  { %2770 = vmatprep.subr.mxu0 %v3096_v0  ;;  %2779 = vmatprep.subr.mxu1 %v3096_v0 }
 0xaf1   :  { %2771 = vmatpush3.msra.mxu0 %v3141_v7  ;;  %2780 = vmatpush3.msra.mxu1 %v3188_v35 }
 0xaf2   :  { %2772 = vmatprep.subr.mxu0 %v3096_v0  ;;  %2781 = vmatprep.subr.mxu1 %v3096_v0 }
 0xaf3   :  { %2773 = vmatpush3.msra.mxu0 %v3145_v9  ;;  %2782 = vmatpush3.msra.mxu1 %v3199_v38 }
 0xaf4   :  { %2775 = vmatmul.mubr.msk.f32.vlgmr.msra.gmra.mxu0 %vm63_vm1, %v1199_v25  ;;  %2783 = vmatprep.subr.mxu1 %v3096_v0 }
 0xaf5   :  { %2788 = vmatprep.subr.mxu0 %v3096_v0  ;;  %2784 = vmatpush3.msra.mxu1 %v3208_v40 }
 0xaf6   :  { %2789 = vmatpush3.msra.mxu0 %v3176_v31  ;;  %2785 = vmatprep.mubr.msk.f32.mxu1 %vm3097_vm0, %v3096_v0 }
 0xaf7   :  { %2790 = vmatprep.subr.mxu0 %v3096_v0  ;;  %2799 = vmatprep.subr.mxu1 %v3096_v0 }
 0xaf8   :  { %2791 = vmatpush3.msra.mxu0 %v3190_v36  ;;  %2796 = vmatprep.mubr.msk.f32.mxu0 %vm3097_vm0, %v3096_v0 }
 0xaf9   :  { %2792 = vmatprep.subr.mxu0 %v3096_v0 }
 0xafa   :  { %2793 = vmatpush3.msra.mxu0 %v3210_v41 }
 0xafb   :  { %2794 = vmatprep.subr.mxu0 %v3096_v0 }
 0xafc   :  { %2795 = vmatpush3.msra.mxu0 %v3231_v46 }
 0xafd   :  { %2810 = vmatprep.subr.mxu0 %v3096_v0 }
 0xbac   :  { %v1193_v26 = vpop.f32.mrf.mxu0 }
 0xbad   :  { %v1268_v27 = vpop.f32.mrf.mxu1 }
 0xbae   :  { %v1269_v29 = vadd.f32 %v1268_v27, %v1193_v26  ;;  %v2754_v32 = vpop.f32.mrf.mxu0 }
 0xbaf   :  { %v2765_v34 = vpop.f32.mrf.mxu1 }
 0xbb0   :  { %v1272_v28 = vadd.f32 %v3286_v59, %v1269_v29 }
 0xbb2   :  { %2963 = vtanh.f32 %v1272_v28  ;;  %v2461_v45 = vmul.f32 -1.442695, %v1272_v28 }
 0xbb4   :  { %v1369_v39 = vpop.f32.mrf.mxu0 }
 0xbb5   :  { %v1373_v42 = vadd.f32 %v1369_v39, %v175_v37 }
 0xbb6   :  { %v2776_v30 = vpop.f32.mrf.mxu0 }
 0xbb7   :  { %2965 = vtanh.f32 %v1373_v42  ;;  %v2463_v47 = vmul.f32 -1.442695, %v1373_v42 }
 0xbb8   :  { %2967 = vpow2.f32 %v2461_v45 }
 0xbb9   :  { %2969 = vpow2.f32 %v2463_v47 }
 0xbbf   :  { %v2964_v43 = vpop.eup %2963 }
 0xbc0   :  { %1282 = vrot.lane.b32.xlu0 %v2964_v43, %s3098_s24 }
 0xbc4   :  { %v2966_v44 = vpop.eup %2965 }
 0xbc5   :  { %1383 = vrot.lane.b32.xlu1 %v2966_v44, %s3098_s24  ;;  %v2968_v48 = vpop.eup %2967 }
 0xbc6   :  { %v1276_v49 = vadd.f32 1.0, %v2968_v48  ;;  %v2970_v50 = vpop.eup %2969 }
 0xbc7   :  { %v1377_v51 = vadd.f32 1.0, %v2970_v50 }
 0xbc8   :  { %2971 = vrcp.f32 %v1276_v49 }
 0xbc9   :  { %2973 = vrcp.f32 %v1377_v51 }
 0xbd5   :  { %v2972_v55 = vpop.eup %2971 }
 0xbd6   :  { %v2974_v61 = vpop.eup %2973  ;;  %v1280_v63 = vmul.f32 %v2972_v55, %v3404_v16 }
 0xbd7   :  { %v1381_v5 = vmul.f32 %v2974_v61, %v3406_v17 }
 0xc32   :  { %v1283_v58 = vpop.permute.xlu0 %1282 }
 0xc33   :  { %v1285_v60 = vmul.f32 %v2972_v55, %v1283_v58 }
 0xc35   :  { %1287 = vrot.lane.b32.xlu0 %v1285_v60, %s3098_s24 }
 0xc37   :  { %v1384_v52 = vpop.permute.xlu1 %1383 }
 0xc38   :  { %v1386_v62 = vmul.f32 %v2974_v61, %v1384_v52 }
 0xc3a   :  { %1388 = vrot.lane.b32.xlu1 %v1386_v62, %s3098_s24 }
 0xca7   :  { %v1288_v1 = vpop.permute.xlu0 %1287 }
 0xca8   :  { %v3456_v2 = vadd.f32 %v1288_v1, %v1280_v63  ;;  %v3523_v63 = vld [vmem:[#allocation2 + $0x38] sm:$0xff]  ;;  %v3529_v1 = vld [vmem:[#allocation2 + $0x30] sm:$0xff] }
 0xcaa   :  { %2975 = vtanh.f32 %v3456_v2 }
 0xcac   :  { %v1389_v6 = vpop.permute.xlu1 %1388 }
 0xcad   :  { %v3460_v8 = vadd.f32 %v1389_v6, %v1381_v5  ;;  %v3541_v5 = vld [vmem:[#allocation2 + $0x20] sm:$0xff] }
 0xcae   :  { %v3563_v6 = vld [vmem:[#allocation2 + $0x40] ss:$0 sm:$0xff] }
 0xcaf   :  { %2977 = vtanh.f32 %v3460_v8 }
 0xcb7   :  { %v2976_v10 = vpop.eup %2975 }
 0xcb8   :  { %1293 = vrot.lane.b32.xlu0 %v2976_v10, %s3098_s24 }
 0xcbc   :  { %v2978_v11 = vpop.eup %2977 }
 0xcbd   :  { %1394 = vrot.lane.b32.xlu1 %v2978_v11, %s3098_s24 }
 0xd2a   :  { %v1294_v12 = vpop.permute.xlu0 %1293 }
 0xd2b   :  { %v1296_v53 = vmul.f32 %v2972_v55, %v1294_v12 }
 0xd2d   :  { %1298 = vrot.lane.b32.xlu0 %v1296_v53, %s3099_s0 }
 0xd2f   :  { %v1395_v13 = vpop.permute.xlu1 %1394 }
 0xd30   :  { %v1397_v15 = vmul.f32 %v2974_v61, %v1395_v13 }
 0xd32   :  { %1471 = vrot.lane.b32.xlu1 %v1397_v15, %s3099_s0 }
 0xd9f   :  { %v1299_v16 = vpop.permute.xlu0 %1298 }
 0xda0   :  { %1302 = vst.msk [vmem:[#allocation5 + $0x18] sm:$0xff] %vm63_vm1, %v1299_v16  ;;  %2786 = vmatmul.mubr.msk.f32.vlgmr.msra.gmra.mxu1 %vm63_vm1, %v1299_v16 }
 0xda1   :  { %2800 = vmatpush3.msra.mxu1 %v3131_v3  ;;  %2807 = vmatprep.mubr.msk.f32.mxu1 %vm3097_vm0, %v3096_v0 }
 0xda2   :  { %2801 = vmatprep.subr.mxu1 %v3096_v0 }
 0xda3   :  { %2802 = vmatpush3.msra.mxu1 %v3134_v4 }
 0xda4   :  { %2803 = vmatprep.subr.mxu1 %v3096_v0  ;;  %v1472_v17 = vpop.permute.xlu1 %1471 }
 0xda5   :  { %2804 = vmatpush3.msra.mxu1 %v3141_v7  ;;  %2797 = vmatmul.mubr.msk.f32.vlgmr.msra.gmra.mxu0 %vm63_vm1, %v1472_v17 }
 0xda6   :  { %2805 = vmatprep.subr.mxu1 %v3096_v0  ;;  %2811 = vmatpush3.msra.mxu0 %v3181_v33 }
 0xda7   :  { %2806 = vmatpush3.msra.mxu1 %v3145_v9  ;;  %2812 = vmatprep.subr.mxu0 %v3096_v0 }
 0xda8   :  { %2808 = vmatmul.mubr.msk.f32.vlgmr.msra.gmra.mxu1 %vm63_vm1, %v1472_v17  ;;  %2821 = vmatprep.subr.mxu1 %v3096_v0 }
 0xda9   :  { %2822 = vmatpush3.msra.mxu1 %v3176_v31  ;;  %2813 = vmatpush3.msra.mxu0 %v3188_v35 }
 0xdaa   :  { %2823 = vmatprep.subr.mxu1 %v3096_v0  ;;  %2814 = vmatprep.subr.mxu0 %v3096_v0 }
 0xdab   :  { %2824 = vmatpush3.msra.mxu1 %v3190_v36  ;;  %2815 = vmatpush3.msra.mxu0 %v3199_v38 }
 0xdac   :  { %2825 = vmatprep.subr.mxu1 %v3096_v0  ;;  %2816 = vmatprep.subr.mxu0 %v3096_v0 }
 0xdad   :  { %2826 = vmatpush3.msra.mxu1 %v3210_v41  ;;  %2817 = vmatpush3.msra.mxu0 %v3208_v40 }
 0xdae   :  { %2827 = vmatprep.subr.mxu1 %v3096_v0  ;;  %2829 = vmatprep.mubr.msk.f32.mxu1 %vm3097_vm0, %v3096_v0 }
 0xdaf   :  { %2828 = vmatpush3.msra.mxu1 %v3231_v46  ;;  %2818 = vmatprep.mubr.msk.f32.mxu0 %vm3097_vm0, %v3096_v0 }
 0xdb0   :  { %2832 = vmatprep.subr.mxu0 %v3096_v0  ;;  %2843 = vmatprep.subr.mxu1 %v3096_v0 }
 0xe60   :  { %v1466_v3 = vpop.f32.mrf.mxu1 }
 0xe62   :  { %v2787_v4 = vpop.f32.mrf.mxu1 }
 0xe65   :  { %v1541_v7 = vpop.f32.mrf.mxu0 }
 0xe66   :  { %v1542_v9 = vadd.f32 %v1541_v7, %v1466_v3 }
 0xe67   :  { %v2798_v19 = vpop.f32.mrf.mxu0 }
 0xe68   :  { %v1545_v20 = vadd.f32 %v3286_v59, %v1542_v9  ;;  %v1642_v21 = vpop.f32.mrf.mxu1 }
 0xe69   :  { %v1646_v22 = vadd.f32 %v1642_v21, %v180_v18 }
 0xe6a   :  { %2979 = vtanh.f32 %v1545_v20  ;;  %v2809_v23 = vpop.f32.mrf.mxu1  ;;  %v2466_v26 = vmul.f32 -1.442695, %v1545_v20 }
 0xe6b   :  { %2981 = vtanh.f32 %v1646_v22  ;;  %v2468_v27 = vmul.f32 -1.442695, %v1646_v22 }
 0xe6c   :  { %2983 = vpow2.f32 %v2466_v26 }
 0xe6d   :  { %2985 = vpow2.f32 %v2468_v27 }
 0xe77   :  { %v2980_v24 = vpop.eup %2979 }
 0xe78   :  { %v2982_v25 = vpop.eup %2981  ;;  %1555 = vrot.lane.b32.xlu0 %v2980_v24, %s3098_s24 }
 0xe79   :  { %1656 = vrot.lane.b32.xlu1 %v2982_v25, %s3098_s24  ;;  %v2984_v29 = vpop.eup %2983 }
 0xe7a   :  { %v2986_v14 = vpop.eup %2985  ;;  %v1549_v54 = vadd.f32 1.0, %v2984_v29 }
 0xe7b   :  { %v1650_v32 = vadd.f32 1.0, %v2986_v14 }
 0xe7c   :  { %2987 = vrcp.f32 %v1549_v54 }
 0xe7d   :  { %2989 = vrcp.f32 %v1650_v32 }
 0xe89   :  { %v2988_v34 = vpop.eup %2987 }
 0xe8a   :  { %v2990_v37 = vpop.eup %2989  ;;  %v1553_v43 = vmul.f32 %v2988_v34, %v3456_v2  ;;  %v3535_v2 = vld [vmem:[#allocation2 + $0x28] sm:$0xff] }
 0xe8b   :  { %v1654_v44 = vmul.f32 %v2990_v37, %v3460_v8  ;;  %v185_v8 = vadd.f32 %v3563_v6, %v3282_v57 }
 0xeea   :  { %v1556_v28 = vpop.permute.xlu0 %1555 }
 0xeeb   :  { %v1657_v39 = vpop.permute.xlu1 %1656  ;;  %v1558_v42 = vmul.f32 %v2988_v34, %v1556_v28  ;;  %v3040_v28 = vld [vmem:[#allocation2 + $0x80] sm:$0xff] }
 0xeec   :  { %v1659_v30 = vmul.f32 %v2990_v37, %v1657_v39  ;;  %v3042_v39 = vld [vmem:[#allocation2 + $0x78] sm:$0xff] }
 0xeed   :  { %1560 = vrot.lane.b32.xlu0 %v1558_v42, %s3098_s24  ;;  %v3043_v42 = vld [vmem:[#allocation2 + $0x58] sm:$0xff] }
 0xeee   :  { %1661 = vrot.lane.b32.xlu1 %v1659_v30, %s3098_s24  ;;  %v3044_v30 = vld [vmem:[#allocation2 + $0x70] sm:$0xff] }
 0xf5f   :  { %v1561_v45 = vpop.permute.xlu0 %1560 }
 0xf60   :  { %v1662_v47 = vpop.permute.xlu1 %1661  ;;  %v3510_v48 = vadd.f32 %v1561_v45, %v1553_v43  ;;  %v3045_v43 = vld [vmem:[#allocation2 + $0x50] sm:$0xff]  ;;  %v3047_v45 = vld [vmem:[#allocation2 + $0x48] sm:$0xff] }
 0xf61   :  { %v3512_v49 = vadd.f32 %v1662_v47, %v1654_v44  ;;  %v3046_v44 = vld [vmem:[#allocation2 + $0x68] sm:$0xff] }
 0xf62   :  { %2991 = vtanh.f32 %v3510_v48 }
 0xf63   :  { %2993 = vtanh.f32 %v3512_v49 }
 0xf6f   :  { %v2992_v50 = vpop.eup %2991 }
 0xf70   :  { %v2994_v51 = vpop.eup %2993  ;;  %1566 = vrot.lane.b32.xlu0 %v2992_v50, %s3098_s24 }
 0xf71   :  { %1667 = vrot.lane.b32.xlu1 %v2994_v51, %s3098_s24  ;;  %v190_v51 = vadd.f32 %v3563_v6, %v3280_v56 }
 0xfe2   :  { %v1567_v55 = vpop.permute.xlu0 %1566 }
 0xfe3   :  { %v1668_v58 = vpop.permute.xlu1 %1667  ;;  %v1569_v60 = vmul.f32 %v2988_v34, %v1567_v55 }
 0xfe4   :  { %v1670_v61 = vmul.f32 %v2990_v37, %v1668_v58  ;;  %v3041_v37 = vld [vmem:[#allocation2 + $0x60] sm:$0xff]  ;;  %v3048_v58 = vld [vmem:[#allocation2 + $0x88] ss:$0 sm:$0xff] }
 0xfe5   :  { %1571 = vrot.lane.b32.xlu0 %v1569_v60, %s3099_s0 }
 0xfe6   :  { %1744 = vrot.lane.b32.xlu1 %v1670_v61, %s3099_s0 }
0x1057   :  { %v1572_v52 = vpop.permute.xlu0 %1571 }
0x1058   :  { %v1745_v62 = vpop.permute.xlu1 %1744  ;;  %1575 = vst.msk [vmem:[#allocation5 + $0x20] sm:$0xff] %vm63_vm1, %v1572_v52  ;;  %2819 = vmatmul.mubr.msk.f32.vlgmr.msra.gmra.mxu0 %vm63_vm1, %v1572_v52 }
0x1059   :  { %2830 = vmatmul.mubr.msk.f32.vlgmr.msra.gmra.mxu1 %vm63_vm1, %v1745_v62  ;;  %2833 = vmatpush3.msra.mxu0 %v3523_v63 }
0x105a   :  { %2834 = vmatprep.subr.mxu0 %v3096_v0  ;;  %2840 = vmatprep.mubr.msk.f32.mxu0 %vm3097_vm0, %v3096_v0 }
0x105b   :  { %2835 = vmatpush3.msra.mxu0 %v3529_v1  ;;  %2844 = vmatpush3.msra.mxu1 %v3181_v33 }
0x105c   :  { %2836 = vmatprep.subr.mxu0 %v3096_v0  ;;  %2845 = vmatprep.subr.mxu1 %v3096_v0 }
0x105d   :  { %2837 = vmatpush3.msra.mxu0 %v3535_v2  ;;  %2846 = vmatpush3.msra.mxu1 %v3188_v35 }
0x105e   :  { %2838 = vmatprep.subr.mxu0 %v3096_v0  ;;  %2847 = vmatprep.subr.mxu1 %v3096_v0 }
0x105f   :  { %2839 = vmatpush3.msra.mxu0 %v3541_v5  ;;  %2848 = vmatpush3.msra.mxu1 %v3199_v38 }
0x1060   :  { %2841 = vmatmul.mubr.msk.f32.vlgmr.msra.gmra.mxu0 %vm63_vm1, %v1745_v62  ;;  %2849 = vmatprep.subr.mxu1 %v3096_v0 }
0x1061   :  { %2854 = vmatprep.subr.mxu0 %v3096_v0  ;;  %2850 = vmatpush3.msra.mxu1 %v3208_v40 }
0x1062   :  { %2855 = vmatpush3.msra.mxu0 %v3176_v31  ;;  %2851 = vmatprep.mubr.msk.f32.mxu1 %vm3097_vm0, %v3096_v0 }
0x1063   :  { %2856 = vmatprep.subr.mxu0 %v3096_v0  ;;  %2865 = vmatprep.subr.mxu1 %v3096_v0 }
0x1064   :  { %2857 = vmatpush3.msra.mxu0 %v3190_v36  ;;  %2862 = vmatprep.mubr.msk.f32.mxu0 %vm3097_vm0, %v3096_v0 }
0x1065   :  { %2858 = vmatprep.subr.mxu0 %v3096_v0 }
0x1066   :  { %2859 = vmatpush3.msra.mxu0 %v3210_v41 }
0x1067   :  { %2860 = vmatprep.subr.mxu0 %v3096_v0 }
0x1068   :  { %2861 = vmatpush3.msra.mxu0 %v3231_v46 }
0x1069   :  { %2876 = vmatprep.subr.mxu0 %v3096_v0 }
0x1118   :  { %v1739_v31 = vpop.f32.mrf.mxu0 }
0x1119   :  { %v1814_v33 = vpop.f32.mrf.mxu1 }
0x111a   :  { %v1815_v35 = vadd.f32 %v1814_v33, %v1739_v31  ;;  %v2820_v38 = vpop.f32.mrf.mxu0 }
0x111b   :  { %v2831_v40 = vpop.f32.mrf.mxu1 }
0x111c   :  { %v1818_v36 = vadd.f32 %v3286_v59, %v1815_v35 }
0x111e   :  { %2995 = vtanh.f32 %v1818_v36  ;;  %v2471_v53 = vmul.f32 -1.442695, %v1818_v36 }
0x1120   :  { %v1915_v41 = vpop.f32.mrf.mxu0 }
0x1121   :  { %v1919_v10 = vadd.f32 %v1915_v41, %v185_v8 }
0x1122   :  { %v2842_v11 = vpop.f32.mrf.mxu0 }
0x1123   :  { %2997 = vtanh.f32 %v1919_v10  ;;  %v2473_v13 = vmul.f32 -1.442695, %v1919_v10 }
0x1124   :  { %2999 = vpow2.f32 %v2471_v53 }
0x1125   :  { %3001 = vpow2.f32 %v2473_v13 }
0x112b   :  { %v2996_v46 = vpop.eup %2995 }
0x112c   :  { %1828 = vrot.lane.b32.xlu0 %v2996_v46, %s3098_s24 }
0x1130   :  { %v2998_v12 = vpop.eup %2997 }
0x1131   :  { %1929 = vrot.lane.b32.xlu1 %v2998_v12, %s3098_s24  ;;  %v3000_v59 = vpop.eup %2999 }
0x1132   :  { %v1822_v15 = vadd.f32 1.0, %v3000_v59  ;;  %v3002_v16 = vpop.eup %3001 }
0x1133   :  { %v1923_v17 = vadd.f32 1.0, %v3002_v16 }
0x1134   :  { %3003 = vrcp.f32 %v1822_v15 }
0x1135   :  { %3005 = vrcp.f32 %v1923_v17 }
0x1141   :  { %v3004_v57 = vpop.eup %3003 }
0x1142   :  { %v3006_v7 = vpop.eup %3005  ;;  %v1826_v19 = vmul.f32 %v3004_v57, %v3510_v48 }
0x1143   :  { %v1927_v22 = vmul.f32 %v3006_v7, %v3512_v49 }
0x119e   :  { %v1829_v3 = vpop.permute.xlu0 %1828 }
0x119f   :  { %v1831_v4 = vmul.f32 %v3004_v57, %v1829_v3 }
0x11a1   :  { %1833 = vrot.lane.b32.xlu0 %v1831_v4, %s3098_s24 }
0x11a3   :  { %v1930_v9 = vpop.permute.xlu1 %1929 }
0x11a4   :  { %v1932_v18 = vmul.f32 %v3006_v7, %v1930_v9 }
0x11a6   :  { %1934 = vrot.lane.b32.xlu1 %v1932_v18, %s3098_s24 }
0x1213   :  { %v1834_v20 = vpop.permute.xlu0 %1833 }
0x1214   :  { %v3572_v21 = vadd.f32 %v1834_v20, %v1826_v19 }
0x1216   :  { %3007 = vtanh.f32 %v3572_v21 }
0x1218   :  { %v1935_v23 = vpop.permute.xlu1 %1934 }
0x1219   :  { %v3576_v24 = vadd.f32 %v1935_v23, %v1927_v22 }
0x121b   :  { %3009 = vtanh.f32 %v3576_v24 }
0x1223   :  { %v3008_v25 = vpop.eup %3007 }
0x1224   :  { %1839 = vrot.lane.b32.xlu0 %v3008_v25, %s3098_s24 }
0x1228   :  { %v3010_v26 = vpop.eup %3009 }
0x1229   :  { %1940 = vrot.lane.b32.xlu1 %v3010_v26, %s3098_s24 }
0x1296   :  { %v1840_v27 = vpop.permute.xlu0 %1839 }
0x1297   :  { %v1842_v29 = vmul.f32 %v3004_v57, %v1840_v27 }
0x1299   :  { %1844 = vrot.lane.b32.xlu0 %v1842_v29, %s3099_s0 }
0x129b   :  { %v1941_v14 = vpop.permute.xlu1 %1940 }
0x129c   :  { %v1943_v54 = vmul.f32 %v3006_v7, %v1941_v14 }
0x129e   :  { %2017 = vrot.lane.b32.xlu1 %v1943_v54, %s3099_s0 }
0x130b   :  { %v1845_v32 = vpop.permute.xlu0 %1844 }
0x130c   :  { %1848 = vst.msk [vmem:[#allocation5 + $0x28] sm:$0xff] %vm63_vm1, %v1845_v32  ;;  %2852 = vmatmul.mubr.msk.f32.vlgmr.msra.gmra.mxu1 %vm63_vm1, %v1845_v32 }
0x130d   :  { %2866 = vmatpush3.msra.mxu1 %v3523_v63  ;;  %2873 = vmatprep.mubr.msk.f32.mxu1 %vm3097_vm0, %v3096_v0 }
0x130e   :  { %2867 = vmatprep.subr.mxu1 %v3096_v0 }
0x130f   :  { %2868 = vmatpush3.msra.mxu1 %v3529_v1 }
0x1310   :  { %2869 = vmatprep.subr.mxu1 %v3096_v0  ;;  %v2018_v34 = vpop.permute.xlu1 %2017 }
0x1311   :  { %2870 = vmatpush3.msra.mxu1 %v3535_v2  ;;  %2863 = vmatmul.mubr.msk.f32.vlgmr.msra.gmra.mxu0 %vm63_vm1, %v2018_v34 }
0x1312   :  { %2871 = vmatprep.subr.mxu1 %v3096_v0  ;;  %2877 = vmatpush3.msra.mxu0 %v3040_v28 }
0x1313   :  { %2872 = vmatpush3.msra.mxu1 %v3541_v5  ;;  %2878 = vmatprep.subr.mxu0 %v3096_v0 }
0x1314   :  { %2874 = vmatmul.mubr.msk.f32.vlgmr.msra.gmra.mxu1 %vm63_vm1, %v2018_v34  ;;  %2887 = vmatprep.subr.mxu1 %v3096_v0 }
0x1315   :  { %2888 = vmatpush3.msra.mxu1 %v3041_v37  ;;  %2879 = vmatpush3.msra.mxu0 %v3042_v39 }
0x1316   :  { %2889 = vmatprep.subr.mxu1 %v3096_v0  ;;  %2880 = vmatprep.subr.mxu0 %v3096_v0 }
0x1317   :  { %2890 = vmatpush3.msra.mxu1 %v3043_v42  ;;  %2881 = vmatpush3.msra.mxu0 %v3044_v30 }
0x1318   :  { %2891 = vmatprep.subr.mxu1 %v3096_v0  ;;  %2882 = vmatprep.subr.mxu0 %v3096_v0 }
0x1319   :  { %2892 = vmatpush3.msra.mxu1 %v3045_v43  ;;  %2895 = vmatprep.mubr.msk.f32.mxu1 %vm3097_vm0, %v3096_v0 }
0x131a   :  { %2893 = vmatprep.subr.mxu1 %v3096_v0  ;;  %2883 = vmatpush3.msra.mxu0 %v3046_v44 }
0x131b   :  { %2894 = vmatpush3.msra.mxu1 %v3047_v45  ;;  %2884 = vmatprep.mubr.msk.f32.mxu0 %vm3097_vm0, %v3096_v0 }
0x13cc   :  { %v2012_v47 = vpop.f32.mrf.mxu1 }
0x13ce   :  { %v2853_v48 = vpop.f32.mrf.mxu1 }
0x13d1   :  { %v2087_v49 = vpop.f32.mrf.mxu0 }
0x13d2   :  { %v2088_v50 = vadd.f32 %v2087_v49, %v2012_v47 }
0x13d3   :  { %v2864_v55 = vpop.f32.mrf.mxu0 }
0x13d4   :  { %v2091_v60 = vadd.f32 %v3048_v58, %v2088_v50  ;;  %v2188_v61 = vpop.f32.mrf.mxu1 }
0x13d5   :  { %v2192_v52 = vadd.f32 %v2188_v61, %v190_v51 }
0x13d6   :  { %3011 = vtanh.f32 %v2091_v60  ;;  %v2875_v62 = vpop.f32.mrf.mxu1  ;;  %v2476_v0 = vmul.f32 -1.442695, %v2091_v60 }
0x13d7   :  { %3013 = vtanh.f32 %v2192_v52  ;;  %v2478_v2 = vmul.f32 -1.442695, %v2192_v52 }
0x13d8   :  { %3015 = vpow2.f32 %v2476_v0 }
0x13d9   :  { %3017 = vpow2.f32 %v2478_v2 }
0x13e3   :  { %v3012_v63 = vpop.eup %3011 }
0x13e4   :  { %v3014_v1 = vpop.eup %3013  ;;  %2101 = vrot.lane.b32.xlu0 %v3012_v63, %s3098_s24 }
0x13e5   :  { %2202 = vrot.lane.b32.xlu1 %v3014_v1, %s3098_s24  ;;  %v3016_v5 = vpop.eup %3015 }
0x13e6   :  { %v3018_v56 = vpop.eup %3017  ;;  %v2095_v31 = vadd.f32 1.0, %v3016_v5 }
0x13e7   :  { %v2196_v33 = vadd.f32 1.0, %v3018_v56 }
0x13e8   :  { %3019 = vrcp.f32 %v2095_v31 }
0x13e9   :  { %3021 = vrcp.f32 %v2196_v33 }
0x13f5   :  { %v3020_v35 = vpop.eup %3019 }
0x13f6   :  { %v3022_v40 = vpop.eup %3021  ;;  %v2099_v41 = vmul.f32 %v3020_v35, %v3572_v21 }
0x13f7   :  { %v2200_v10 = vmul.f32 %v3022_v40, %v3576_v24 }
0x1456   :  { %v2102_v38 = vpop.permute.xlu0 %2101 }
0x1457   :  { %v2203_v36 = vpop.permute.xlu1 %2202  ;;  %v2104_v6 = vmul.f32 %v3020_v35, %v2102_v38 }
0x1458   :  { %v2205_v8 = vmul.f32 %v3022_v40, %v2203_v36 }
0x1459   :  { %2106 = vrot.lane.b32.xlu0 %v2104_v6, %s3098_s24 }
0x145a   :  { %2207 = vrot.lane.b32.xlu1 %v2205_v8, %s3098_s24 }
0x14cb   :  { %v2107_v11 = vpop.permute.xlu0 %2106 }
0x14cc   :  { %v2208_v46 = vpop.permute.xlu1 %2207  ;;  %v2109_v12 = vadd.f32 %v2107_v11, %v2099_v41 }
0x14cd   :  { %v2210_v53 = vadd.f32 %v2208_v46, %v2200_v10 }
0x14ce   :  { %3023 = vtanh.f32 %v2109_v12 }
0x14cf   :  { %3025 = vtanh.f32 %v2210_v53 }
0x14db   :  { %v3024_v13 = vpop.eup %3023 }
0x14dc   :  { %v3026_v59 = vpop.eup %3025  ;;  %2112 = vrot.lane.b32.xlu0 %v3024_v13, %s3098_s24 }
0x14dd   :  { %2213 = vrot.lane.b32.xlu1 %v3026_v59, %s3098_s24 }
0x154e   :  { %v2113_v15 = vpop.permute.xlu0 %2112 }
0x154f   :  { %v2214_v16 = vpop.permute.xlu1 %2213  ;;  %v2115_v17 = vmul.f32 %v3020_v35, %v2113_v15 }
0x1550   :  { %v2216_v57 = vmul.f32 %v3022_v40, %v2214_v16 }
0x1551   :  { %2117 = vrot.lane.b32.xlu0 %v2115_v17, %s3099_s0 }
0x1552   :  { %2290 = vrot.lane.b32.xlu1 %v2216_v57, %s3099_s0 }
0x15c3   :  { %v2118_v3 = vpop.permute.xlu0 %2117 }
0x15c4   :  { %v2291_v4 = vpop.permute.xlu1 %2290  ;;  %2121 = vst.msk [vmem:[#allocation5 + $0x30] sm:$0xff] %vm63_vm1, %v2118_v3  ;;  %2885 = vmatmul.mubr.msk.f32.vlgmr.msra.gmra.mxu0 %vm63_vm1, %v2118_v3 }
0x15c5   :  { %2397 = vst.msk [vmem:[#allocation5 + $0x40] sm:$0xff] %vm63_vm1, %v2291_v4  ;;  %2896 = vmatmul.mubr.msk.f32.vlgmr.msra.gmra.mxu1 %vm63_vm1, %v2291_v4 }
0x1684   :  { %v2285_v7 = vpop.f32.mrf.mxu0 }
0x1685   :  { %v2360_v9 = vpop.f32.mrf.mxu1 }
0x1686   :  { %v2361_v18 = vadd.f32 %v2360_v9, %v2285_v7  ;;  %v2886_v19 = vpop.f32.mrf.mxu0 }
0x1687   :  { %v2897_v20 = vpop.f32.mrf.mxu1 }
0x1688   :  { %v2364_v21 = vadd.f32 %v3048_v58, %v2361_v18 }
0x168a   :  { %3027 = vtanh.f32 %v2364_v21  ;;  %v2481_v23 = vmul.f32 -1.442695, %v2364_v21 }
0x168c   :  { %3029 = vpow2.f32 %v2481_v23 }
0x1697   :  { %v3028_v22 = vpop.eup %3027 }
0x1698   :  { %2374 = vrot.lane.b32.xlu0 %v3028_v22, %s3098_s24 }
0x1699   :  { %v3030_v24 = vpop.eup %3029 }
0x169a   :  { %v2368_v25 = vadd.f32 1.0, %v3030_v24 }
0x169c   :  { %3031 = vrcp.f32 %v2368_v25 }
0x16a9   :  { %v3032_v26 = vpop.eup %3031 }
0x16aa   :  { %v2372_v14 = vmul.f32 %v3032_v26, %v2109_v12 }
0x170a   :  { %v2375_v27 = vpop.permute.xlu0 %2374 }
0x170b   :  { %v2377_v29 = vmul.f32 %v3032_v26, %v2375_v27 }
0x170d   :  { %2379 = vrot.lane.b32.xlu1 %v2377_v29, %s3098_s24 }
0x177f   :  { %v2380_v54 = vpop.permute.xlu1 %2379 }
0x1780   :  { %v2382_v32 = vadd.f32 %v2380_v54, %v2372_v14 }
0x1782   :  { %3033 = vtanh.f32 %v2382_v32 }
0x178f   :  { %v3034_v34 = vpop.eup %3033 }
0x1790   :  { %2385 = vrot.lane.b32.xlu0 %v3034_v34, %s3098_s24 }
0x1794   :  { %2399 = vrot.lane.b32.xlu0 %v2210_v53, %s3100_s1 }
0x1802   :  { %v2386_v28 = vpop.permute.xlu0 %2385 }
0x1803   :  { %v2388_v37 = vmul.f32 %v3032_v26, %v2386_v28 }
0x1805   :  { %2390 = vrot.lane.b32.xlu1 %v2388_v37, %s3099_s0 }
0x1806   :  { %v2400_v39 = vpop.permute.xlu0 %2399 }
0x1807   :  { %2403 = vst.msk [vmem:[#allocation5 + $0x50] sm:$0xff] %vm63_vm1, %v2400_v39 }
0x1809   :  { %2407 = vrot.lane.b32.xlu1 %v2382_v32, %s3100_s1 }
0x1877   :  { %v2391_v42 = vpop.permute.xlu1 %2390 }
0x1878   :  { %2394 = vst.msk [vmem:[#allocation5 + $0x38] sm:$0xff] %vm63_vm1, %v2391_v42  ;;  %2405 = vst.msk [vmem:[#allocation5 + $0x48] sm:$0xff] %vm63_vm1, %v2391_v42 }
0x187b   :  { %v2408_v30 = vpop.permute.xlu1 %2407 }
0x187c   :  { %2411 = vst.msk [vmem:[#allocation5 + $0x58] sm:$0xff] %vm63_vm1, %v2408_v30 }
0x187d   :  { %3080 = shalt.err (!%p3077_p9)
}
0x187e   :  { %2423 = dma.vmem_to_hbm [thread:$0]  %s2418_s2, 1536, %s3640_s3, [#allocation4], %s3094_s15, %s3094_s15, %s3095_s16  }
0x187f   :  { %3091 = dma.done.wait [#allocation4], 1536  }
0x1880   :  { %3092 = vsyncadd [#allocation4], 4294965760 }
0x1881   :  { %2427 = vsyncpa [#allocation3], 1 }
0x1882   :  { %2428 = vsyncpa [#allocation4], 1 }

</bundles_post_ra>
